<compile_context>
chip_gen: v7x
topology: tpu7x:2x2x1
jax: 0.10.0
libtpu: 0.0.40
codegen_flags: <defaults>
</compile_context>

<pallas_src>
import math
from functools import partial

import jax
import jax.numpy as jnp
from jax import lax
from jax.experimental import pallas as pl
from jax.experimental.pallas import tpu as pltpu

_CDT = jnp.bfloat16  # MXU operand dtype


def _linformer_kernel(x_ref, wq_ref, bq_ref, wkq_ref, bkq_ref, wvq_ref, bvq_ref,
                      wkseq_ref, bkseq_ref, wvseq_ref, bvseq_ref,
                      wproj_ref, bproj_ref,
                      out_ref,
                      kp_ref, vp_ref, o_ref,
                      *, num_heads, head_dim, block_s):
    # ---- once per batch: Linformer-reduced K'/V' into head-major scratch ----
    @pl.when(pl.program_id(1) == 0)
    def _():
        x_full = x_ref[0]                                              # (S, dim) bf16
        k_all = jnp.dot(x_full, wkq_ref[...],
                        preferred_element_type=jnp.float32) + bkq_ref[...]   # (S, dim) f32
        v_all = jnp.dot(x_full, wvq_ref[...],
                        preferred_element_type=jnp.float32) + bvq_ref[...]
        kp = jnp.dot(wkseq_ref[...], k_all.astype(_CDT),
                     preferred_element_type=jnp.float32) + bkseq_ref[...]    # (kv, dim)
        vp = jnp.dot(wvseq_ref[...], v_all.astype(_CDT),
                     preferred_element_type=jnp.float32) + bvseq_ref[...]
        kp = kp.astype(_CDT)
        vp = vp.astype(_CDT)
        for h in range(num_heads):                                     # once per batch
            lo = h * head_dim
            kp_ref[h] = kp[:, lo:lo + head_dim]
            vp_ref[h] = vp[:, lo:lo + head_dim]

    # ---- per s-tile: q projection + attention + output projection ----
    s0 = pl.multiple_of(pl.program_id(1) * block_s, block_s)
    xc = x_ref[0, pl.ds(s0, block_s), :]                               # (tS, dim) bf16

    for h in range(num_heads):                                         # static unroll
        # scale 1/sqrt(hd) is folded into wq/bq in the wrapper
        qh = jnp.dot(xc, wq_ref[h],
                     preferred_element_type=jnp.float32) + bq_ref[h]   # (tS, hd) f32
        sc = lax.dot_general(qh.astype(_CDT), kp_ref[h],
                             (((1,), (1,)), ((), ())),
                             preferred_element_type=jnp.float32)       # (tS, kv) f32
        sc = sc - jnp.max(sc, axis=-1, keepdims=True)
        p = jnp.exp(sc)
        p = p * pl.reciprocal(jnp.sum(p, axis=-1, keepdims=True), approx=True)
        oh = jnp.dot(p.astype(_CDT), vp_ref[h],
                     preferred_element_type=jnp.float32)               # (tS, hd) f32
        o_ref[:, h * head_dim:(h + 1) * head_dim] = oh                 # scratch store

    y = jnp.dot(o_ref[...].astype(_CDT), wproj_ref[...],
                preferred_element_type=jnp.float32) + bproj_ref[...]   # (tS, dim)
    out_ref[0] = y.astype(out_ref.dtype)


def linformer_attention(x, params, *, num_heads, block_s=None):
    bs, S, dim = x.shape
    kv = params["wk"].shape[0]
    hd = dim // num_heads
    scale = 1.0 / math.sqrt(hd)

    if block_s is None:
        block_s = S if S <= 128 else 128
    assert S % block_s == 0
    assert block_s == S or block_s % 8 == 0
    n_s = S // block_s

    wqkv = params["wqkv"]                         # (3*dim, dim), rows = (q|k|v)
    bqkv = params["bqkv"]                         # (3*dim,)

    # q weight: per-head (H, dim, hd), 1/sqrt(hd) folded in, bf16
    wq_t = wqkv[0:dim].T                          # (dim_in, dim_out=(H,hd))
    wq_ph = (wq_t.reshape(dim, num_heads, hd).transpose(1, 0, 2) * scale).astype(_CDT)
    bq_ph = (bqkv[0:dim].reshape(num_heads, 1, hd) * scale).astype(jnp.float32)

    # k/v qkv parts: pre-transposed to (in, out), bf16; biases stay f32
    wk_qkv_t = wqkv[dim:2 * dim].T.astype(_CDT)            # (dim, dim)
    bk_qkv = bqkv[dim:2 * dim].reshape(1, dim).astype(jnp.float32)
    wv_qkv_t = wqkv[2 * dim:3 * dim].T.astype(_CDT)
    bv_qkv = bqkv[2 * dim:3 * dim].reshape(1, dim).astype(jnp.float32)

    # Linformer seqlen-reduction weights used as-is: kp_t = Wk @ k + bk
    wk_seq = params["wk"].astype(_CDT)                     # (kv, S)
    bk_seq = params["bk"].reshape(kv, 1).astype(jnp.float32)
    wv_seq = params["wv"].astype(_CDT)
    bv_seq = params["bv"].reshape(kv, 1).astype(jnp.float32)

    # output projection, pre-transposed to (in, out)
    wproj_t = params["wproj"].T.astype(_CDT)               # (dim, dim)
    bproj = params["bproj"].reshape(1, dim).astype(jnp.float32)

    x_b = x.astype(_CDT)

    def rep_spec(arr):
        nd = arr.ndim
        return pl.BlockSpec(arr.shape, lambda b, s, _nd=nd: (0,) * _nd)

    weights = (wq_ph, bq_ph, wk_qkv_t, bk_qkv, wv_qkv_t, bv_qkv,
               wk_seq, bk_seq, wv_seq, bv_seq, wproj_t, bproj)

    kernel = partial(_linformer_kernel, num_heads=num_heads, head_dim=hd,
                     block_s=block_s)

    flops = int(bs * (8 * S * dim * dim + 8 * kv * S * dim))
    transcendentals = int(bs * num_heads * S * (kv + 1))
    bytes_accessed = int(bs * S * dim * (2 + 4)                 # x (bf16) + out (f32)
                         + (4 * dim * dim + 2 * kv * S) * 2     # bf16 weights
                         + (4 * dim + 2 * kv) * 4)              # f32 biases

    # TODO(synk): grid-invariant weight inputs are still double-buffered by the
    # default pipeline; single-buffering them (pl.Buffered(1)) would free VMEM
    # headroom on v7x for larger S tiles.
    return pl.pallas_call(
        kernel,
        out_shape=jax.ShapeDtypeStruct((bs, S, dim), x.dtype),
        grid=(bs, n_s),
        in_specs=[
            # full-sequence x per batch (needed once for the Linformer reduction)
            pl.BlockSpec((1, S, dim), lambda b, s: (b, 0, 0)),
            *[rep_spec(w) for w in weights],
        ],
        out_specs=pl.BlockSpec((1, block_s, dim), lambda b, s: (b, s, 0)),
        scratch_shapes=[
            pltpu.VMEM((num_heads, kv, hd), _CDT),    # K' head-major
            pltpu.VMEM((num_heads, kv, hd), _CDT),    # V' head-major
            pltpu.VMEM((block_s, dim), jnp.float32),  # per-tile head outputs
        ],
        compiler_params=pltpu.CompilerParams(
            dimension_semantics=("parallel", "arbitrary"),
            vmem_limit_bytes=64 * 1024 * 1024,
        ),
        cost_estimate=pl.CostEstimate(flops=flops,
                                      transcendentals=transcendentals,
                                      bytes_accessed=bytes_accessed),
    )(x_b, *weights)


def reference(x, params, num_heads):
    """Pure-JAX f32 reference mirroring the PyTorch forward exactly."""
    bs, S, dim = x.shape
    hd = dim // num_heads
    qkv = x @ params["wqkv"].T + params["bqkv"]                 # (bs, S, 3*dim)
    q, k, v = jnp.split(qkv, 3, axis=-1)
    k = jnp.swapaxes(k, 1, 2)                                   # (bs, dim, S)
    v = jnp.swapaxes(v, 1, 2)
    k = k @ params["wk"].T + params["bk"]                       # (bs, dim, kv)
    v = v @ params["wv"].T + params["bv"]
    kvlen = k.shape[-1]
    q = q.reshape(bs, S, num_heads, hd).transpose(0, 2, 1, 3)          # (bs,H,S,hd)
    k = k.reshape(bs, num_heads, hd, kvlen).transpose(0, 1, 3, 2)      # (bs,H,kv,hd)
    v = v.reshape(bs, num_heads, hd, kvlen).transpose(0, 1, 3, 2)
    s = jnp.einsum("bhqd,bhkd->bhqk", q, k) / math.sqrt(hd)
    p = jax.nn.softmax(s, axis=-1)
    o = jnp.einsum("bhqk,bhkd->bhqd", p, v)
    o = o.transpose(0, 2, 1, 3).reshape(bs, S, dim)
    return o @ params["wproj"].T + params["bproj"]


def init_params(key, dim, input_seqlen, kv_seqlen):
    """truncnormal002 init: trunc-normal(std=0.02) weights, zero biases."""
    ks = jax.random.split(key, 4)
    tn = lambda k, shape: 0.02 * jax.random.truncated_normal(k, -2.0, 2.0, shape, jnp.float32)
    return {
        "wqkv": tn(ks[0], (3 * dim, dim)),
        "bqkv": jnp.zeros((3 * dim,), jnp.float32),
        "wk": tn(ks[1], (kv_seqlen, input_seqlen)),
        "bk": jnp.zeros((kv_seqlen,), jnp.float32),
        "wv": tn(ks[2], (kv_seqlen, input_seqlen)),
        "bv": jnp.zeros((kv_seqlen,), jnp.float32),
        "wproj": tn(ks[3], (dim, dim)),
        "bproj": jnp.zeros((dim,), jnp.float32),
    }


if __name__ == "__main__":
    # NOTE: dim=32 / hd=4 is a small demo config; real deployments should keep
    # dim (and ideally kv_seqlen) multiples of 128 for lane-dense stores.
    bs, input_seqlen, kv_seqlen, dim, num_heads = 2, 16, 8, 32, 8

    key = jax.random.PRNGKey(0)
    kx, kp = jax.random.split(key)
    x = jax.random.normal(kx, (bs, input_seqlen, dim), jnp.float32)
    params = init_params(kp, dim, input_seqlen, kv_seqlen)

    # block_s=8 -> 2 sequence tiles per batch, exercising the scratch-reuse path.
    out = linformer_attention(x, params, num_heads=num_heads, block_s=8)
    out = jax.block_until_ready(out)

    ref = reference(x, params, num_heads)
    assert out.shape == (bs, input_seqlen, dim)
    # bf16 MXU operands (f32 accumulation) + approx reciprocal -> looser tolerance.
    assert jnp.allclose(out, ref, atol=5e-3, rtol=5e-2), "mismatch vs reference"
    print("KERNEL_OK")
</pallas_src>

<mosaic_0001>
module attributes {stable_mosaic.version = 11 : i64} {
  func.func @_linformer_kernel(%arg0: i32, %arg1: i32, %arg2: memref<1x16x32xbf16, #tpu.memory_space<vmem>>, %arg3: memref<8x32x4xbf16, #tpu.memory_space<vmem>>, %arg4: memref<8x1x4xf32, #tpu.memory_space<vmem>>, %arg5: memref<32x32xbf16, #tpu.memory_space<vmem>>, %arg6: memref<1x32xf32, #tpu.memory_space<vmem>>, %arg7: memref<32x32xbf16, #tpu.memory_space<vmem>>, %arg8: memref<1x32xf32, #tpu.memory_space<vmem>>, %arg9: memref<8x16xbf16, #tpu.memory_space<vmem>>, %arg10: memref<8x1xf32, #tpu.memory_space<vmem>>, %arg11: memref<8x16xbf16, #tpu.memory_space<vmem>>, %arg12: memref<8x1xf32, #tpu.memory_space<vmem>>, %arg13: memref<32x32xbf16, #tpu.memory_space<vmem>>, %arg14: memref<1x32xf32, #tpu.memory_space<vmem>>, %arg15: memref<1x8x32xf32, #tpu.memory_space<vmem>>, %arg16: memref<8x8x4xbf16, #tpu.memory_space<vmem>>, %arg17: memref<8x8x4xbf16, #tpu.memory_space<vmem>>, %arg18: memref<8x32xf32, #tpu.memory_space<vmem>>) attributes {dimension_semantics = [#tpu.dimension_semantics<parallel>, #tpu.dimension_semantics<arbitrary>], iteration_bounds = array<i64: 2, 2>, scalar_prefetch = 0 : i64, scratch_operands = 3 : i64, tpu.core_type = #tpu.core_type<tc>, window_params = [{transform_indices = @transform_0, window_bounds = array<i64: 1, 16, 32>}, {pipeline_mode = #tpu.pipeline_mode<synchronous>, transform_indices = @transform_1, window_bounds = array<i64: 8, 32, 4>}, {pipeline_mode = #tpu.pipeline_mode<synchronous>, transform_indices = @transform_2, window_bounds = array<i64: 8, 1, 4>}, {pipeline_mode = #tpu.pipeline_mode<synchronous>, transform_indices = @transform_3, window_bounds = array<i64: 32, 32>}, {pipeline_mode = #tpu.pipeline_mode<synchronous>, transform_indices = @transform_4, window_bounds = array<i64: 1, 32>}, {pipeline_mode = #tpu.pipeline_mode<synchronous>, transform_indices = @transform_5, window_bounds = array<i64: 32, 32>}, {pipeline_mode = #tpu.pipeline_mode<synchronous>, transform_indices = @transform_6, window_bounds = array<i64: 1, 32>}, {pipeline_mode = #tpu.pipeline_mode<synchronous>, transform_indices = @transform_7, window_bounds = array<i64: 8, 16>}, {pipeline_mode = #tpu.pipeline_mode<synchronous>, transform_indices = @transform_8, window_bounds = array<i64: 8, 1>}, {pipeline_mode = #tpu.pipeline_mode<synchronous>, transform_indices = @transform_9, window_bounds = array<i64: 8, 16>}, {pipeline_mode = #tpu.pipeline_mode<synchronous>, transform_indices = @transform_10, window_bounds = array<i64: 8, 1>}, {pipeline_mode = #tpu.pipeline_mode<synchronous>, transform_indices = @transform_11, window_bounds = array<i64: 32, 32>}, {pipeline_mode = #tpu.pipeline_mode<synchronous>, transform_indices = @transform_12, window_bounds = array<i64: 1, 32>}, {transform_indices = @transform_13, window_bounds = array<i64: 1, 8, 32>}]} {
    %c0_i32 = arith.constant 0 : i32
    %0 = arith.cmpi eq, %arg1, %c0_i32 : i32
    %1 = arith.extui %0 : i1 to i32
    %c0_i32_0 = arith.constant 0 : i32
    %2 = arith.cmpi ne, %1, %c0_i32_0 : i32
    scf.if %2 {
      %c0_150 = arith.constant 0 : index
      %c0_151 = arith.constant 0 : index
      %c0_152 = arith.constant 0 : index
      %226 = vector.load %arg2[%c0_150, %c0_151, %c0_152] : memref<1x16x32xbf16, #tpu.memory_space<vmem>>, vector<1x16x32xbf16>
      %227 = vector.shape_cast %226 : vector<1x16x32xbf16> to vector<16x32xbf16>
      %c0_153 = arith.constant 0 : index
      %c0_154 = arith.constant 0 : index
      %228 = vector.load %arg5[%c0_153, %c0_154] : memref<32x32xbf16, #tpu.memory_space<vmem>>, vector<32x32xbf16>
      %cst_155 = arith.constant dense<0.000000e+00> : vector<16x32xf32>
      %229 = tpu.matmul %227, %228, %cst_155 {dimension_numbers = #tpu.dot_dimension_numbers<[1], [0], [0], [1], [0, 0, 1, 1], [], []>} : vector<16x32xbf16>, vector<32x32xbf16>, vector<16x32xf32> -> vector<16x32xf32>
      %c0_156 = arith.constant 0 : index
      %c0_157 = arith.constant 0 : index
      %230 = vector.load %arg6[%c0_156, %c0_157] : memref<1x32xf32, #tpu.memory_space<vmem>>, vector<1x32xf32>
      %231 = vector.broadcast %230 : vector<1x32xf32> to vector<16x32xf32>
      %232 = arith.addf %229, %231 : vector<16x32xf32>
      %c0_158 = arith.constant 0 : index
      %c0_159 = arith.constant 0 : index
      %233 = vector.load %arg7[%c0_158, %c0_159] : memref<32x32xbf16, #tpu.memory_space<vmem>>, vector<32x32xbf16>
      %cst_160 = arith.constant dense<0.000000e+00> : vector<16x32xf32>
      %234 = tpu.matmul %227, %233, %cst_160 {dimension_numbers = #tpu.dot_dimension_numbers<[1], [0], [0], [1], [0, 0, 1, 1], [], []>} : vector<16x32xbf16>, vector<32x32xbf16>, vector<16x32xf32> -> vector<16x32xf32>
      %c0_161 = arith.constant 0 : index
      %c0_162 = arith.constant 0 : index
      %235 = vector.load %arg8[%c0_161, %c0_162] : memref<1x32xf32, #tpu.memory_space<vmem>>, vector<1x32xf32>
      %236 = vector.broadcast %235 : vector<1x32xf32> to vector<16x32xf32>
      %237 = arith.addf %234, %236 : vector<16x32xf32>
      %c0_163 = arith.constant 0 : index
      %c0_164 = arith.constant 0 : index
      %238 = vector.load %arg9[%c0_163, %c0_164] : memref<8x16xbf16, #tpu.memory_space<vmem>>, vector<8x16xbf16>
      %239 = arith.truncf %232 : vector<16x32xf32> to vector<16x32xbf16>
      %cst_165 = arith.constant dense<0.000000e+00> : vector<8x32xf32>
      %240 = tpu.matmul %238, %239, %cst_165 {dimension_numbers = #tpu.dot_dimension_numbers<[1], [0], [0], [1], [0, 0, 1, 1], [], []>} : vector<8x16xbf16>, vector<16x32xbf16>, vector<8x32xf32> -> vector<8x32xf32>
      %c0_166 = arith.constant 0 : index
      %c0_167 = arith.constant 0 : index
      %241 = vector.load %arg10[%c0_166, %c0_167] : memref<8x1xf32, #tpu.memory_space<vmem>>, vector<8x1xf32>
      %242 = vector.broadcast %241 : vector<8x1xf32> to vector<8x32xf32>
      %243 = arith.addf %240, %242 : vector<8x32xf32>
      %c0_168 = arith.constant 0 : index
      %c0_169 = arith.constant 0 : index
      %244 = vector.load %arg11[%c0_168, %c0_169] : memref<8x16xbf16, #tpu.memory_space<vmem>>, vector<8x16xbf16>
      %245 = arith.truncf %237 : vector<16x32xf32> to vector<16x32xbf16>
      %cst_170 = arith.constant dense<0.000000e+00> : vector<8x32xf32>
      %246 = tpu.matmul %244, %245, %cst_170 {dimension_numbers = #tpu.dot_dimension_numbers<[1], [0], [0], [1], [0, 0, 1, 1], [], []>} : vector<8x16xbf16>, vector<16x32xbf16>, vector<8x32xf32> -> vector<8x32xf32>
      %c0_171 = arith.constant 0 : index
      %c0_172 = arith.constant 0 : index
      %247 = vector.load %arg12[%c0_171, %c0_172] : memref<8x1xf32, #tpu.memory_space<vmem>>, vector<8x1xf32>
      %248 = vector.broadcast %247 : vector<8x1xf32> to vector<8x32xf32>
      %249 = arith.addf %246, %248 : vector<8x32xf32>
      %250 = arith.truncf %243 : vector<8x32xf32> to vector<8x32xbf16>
      %251 = arith.truncf %249 : vector<8x32xf32> to vector<8x32xbf16>
      %252 = vector.extract_strided_slice %250 {offsets = [0, 0], sizes = [8, 4], strides = [1, 1]} : vector<8x32xbf16> to vector<8x4xbf16>
      %c0_173 = arith.constant 0 : index
      %c0_174 = arith.constant 0 : index
      %c0_175 = arith.constant 0 : index
      %253 = vector.load %arg16[%c0_173, %c0_174, %c0_175] : memref<8x8x4xbf16, #tpu.memory_space<vmem>>, vector<1x8x4xbf16>
      %254 = vector.shape_cast %253 : vector<1x8x4xbf16> to vector<8x4xbf16>
      %255 = vector.shape_cast %252 : vector<8x4xbf16> to vector<1x8x4xbf16>
      tpu.vector_store %arg16[%c0_173, %c0_174, %c0_175], %255 {strides = array<i32>} : memref<8x8x4xbf16, #tpu.memory_space<vmem>>, vector<1x8x4xbf16>,
      %256 = vector.extract_strided_slice %251 {offsets = [0, 0], sizes = [8, 4], strides = [1, 1]} : vector<8x32xbf16> to vector<8x4xbf16>
      %c0_176 = arith.constant 0 : index
      %c0_177 = arith.constant 0 : index
      %c0_178 = arith.constant 0 : index
      %257 = vector.load %arg17[%c0_176, %c0_177, %c0_178] : memref<8x8x4xbf16, #tpu.memory_space<vmem>>, vector<1x8x4xbf16>
      %258 = vector.shape_cast %257 : vector<1x8x4xbf16> to vector<8x4xbf16>
      %259 = vector.shape_cast %256 : vector<8x4xbf16> to vector<1x8x4xbf16>
      tpu.vector_store %arg17[%c0_176, %c0_177, %c0_178], %259 {strides = array<i32>} : memref<8x8x4xbf16, #tpu.memory_space<vmem>>, vector<1x8x4xbf16>,
      %260 = vector.extract_strided_slice %250 {offsets = [0, 4], sizes = [8, 4], strides = [1, 1]} : vector<8x32xbf16> to vector<8x4xbf16>
      %c1_179 = arith.constant 1 : index
      %c0_180 = arith.constant 0 : index
      %c0_181 = arith.constant 0 : index
      %261 = vector.load %arg16[%c1_179, %c0_180, %c0_181] : memref<8x8x4xbf16, #tpu.memory_space<vmem>>, vector<1x8x4xbf16>
      %262 = vector.shape_cast %261 : vector<1x8x4xbf16> to vector<8x4xbf16>
      %263 = vector.shape_cast %260 : vector<8x4xbf16> to vector<1x8x4xbf16>
      tpu.vector_store %arg16[%c1_179, %c0_180, %c0_181], %263 {strides = array<i32>} : memref<8x8x4xbf16, #tpu.memory_space<vmem>>, vector<1x8x4xbf16>,
      %264 = vector.extract_strided_slice %251 {offsets = [0, 4], sizes = [8, 4], strides = [1, 1]} : vector<8x32xbf16> to vector<8x4xbf16>
      %c1_182 = arith.constant 1 : index
      %c0_183 = arith.constant 0 : index
      %c0_184 = arith.constant 0 : index
      %265 = vector.load %arg17[%c1_182, %c0_183, %c0_184] : memref<8x8x4xbf16, #tpu.memory_space<vmem>>, vector<1x8x4xbf16>
      %266 = vector.shape_cast %265 : vector<1x8x4xbf16> to vector<8x4xbf16>
      %267 = vector.shape_cast %264 : vector<8x4xbf16> to vector<1x8x4xbf16>
      tpu.vector_store %arg17[%c1_182, %c0_183, %c0_184], %267 {strides = array<i32>} : memref<8x8x4xbf16, #tpu.memory_space<vmem>>, vector<1x8x4xbf16>,
      %268 = vector.extract_strided_slice %250 {offsets = [0, 8], sizes = [8, 4], strides = [1, 1]} : vector<8x32xbf16> to vector<8x4xbf16>
      %c2_185 = arith.constant 2 : index
      %c0_186 = arith.constant 0 : index
      %c0_187 = arith.constant 0 : index
      %269 = vector.load %arg16[%c2_185, %c0_186, %c0_187] : memref<8x8x4xbf16, #tpu.memory_space<vmem>>, vector<1x8x4xbf16>
      %270 = vector.shape_cast %269 : vector<1x8x4xbf16> to vector<8x4xbf16>
      %271 = vector.shape_cast %268 : vector<8x4xbf16> to vector<1x8x4xbf16>
      tpu.vector_store %arg16[%c2_185, %c0_186, %c0_187], %271 {strides = array<i32>} : memref<8x8x4xbf16, #tpu.memory_space<vmem>>, vector<1x8x4xbf16>,
      %272 = vector.extract_strided_slice %251 {offsets = [0, 8], sizes = [8, 4], strides = [1, 1]} : vector<8x32xbf16> to vector<8x4xbf16>
      %c2_188 = arith.constant 2 : index
      %c0_189 = arith.constant 0 : index
      %c0_190 = arith.constant 0 : index
      %273 = vector.load %arg17[%c2_188, %c0_189, %c0_190] : memref<8x8x4xbf16, #tpu.memory_space<vmem>>, vector<1x8x4xbf16>
      %274 = vector.shape_cast %273 : vector<1x8x4xbf16> to vector<8x4xbf16>
      %275 = vector.shape_cast %272 : vector<8x4xbf16> to vector<1x8x4xbf16>
      tpu.vector_store %arg17[%c2_188, %c0_189, %c0_190], %275 {strides = array<i32>} : memref<8x8x4xbf16, #tpu.memory_space<vmem>>, vector<1x8x4xbf16>,
      %276 = vector.extract_strided_slice %250 {offsets = [0, 12], sizes = [8, 4], strides = [1, 1]} : vector<8x32xbf16> to vector<8x4xbf16>
      %c3_191 = arith.constant 3 : index
      %c0_192 = arith.constant 0 : index
      %c0_193 = arith.constant 0 : index
      %277 = vector.load %arg16[%c3_191, %c0_192, %c0_193] : memref<8x8x4xbf16, #tpu.memory_space<vmem>>, vector<1x8x4xbf16>
      %278 = vector.shape_cast %277 : vector<1x8x4xbf16> to vector<8x4xbf16>
      %279 = vector.shape_cast %276 : vector<8x4xbf16> to vector<1x8x4xbf16>
      tpu.vector_store %arg16[%c3_191, %c0_192, %c0_193], %279 {strides = array<i32>} : memref<8x8x4xbf16, #tpu.memory_space<vmem>>, vector<1x8x4xbf16>,
      %280 = vector.extract_strided_slice %251 {offsets = [0, 12], sizes = [8, 4], strides = [1, 1]} : vector<8x32xbf16> to vector<8x4xbf16>
      %c3_194 = arith.constant 3 : index
      %c0_195 = arith.constant 0 : index
      %c0_196 = arith.constant 0 : index
      %281 = vector.load %arg17[%c3_194, %c0_195, %c0_196] : memref<8x8x4xbf16, #tpu.memory_space<vmem>>, vector<1x8x4xbf16>
      %282 = vector.shape_cast %281 : vector<1x8x4xbf16> to vector<8x4xbf16>
      %283 = vector.shape_cast %280 : vector<8x4xbf16> to vector<1x8x4xbf16>
      tpu.vector_store %arg17[%c3_194, %c0_195, %c0_196], %283 {strides = array<i32>} : memref<8x8x4xbf16, #tpu.memory_space<vmem>>, vector<1x8x4xbf16>,
      %284 = vector.extract_strided_slice %250 {offsets = [0, 16], sizes = [8, 4], strides = [1, 1]} : vector<8x32xbf16> to vector<8x4xbf16>
      %c4_197 = arith.constant 4 : index
      %c0_198 = arith.constant 0 : index
      %c0_199 = arith.constant 0 : index
      %285 = vector.load %arg16[%c4_197, %c0_198, %c0_199] : memref<8x8x4xbf16, #tpu.memory_space<vmem>>, vector<1x8x4xbf16>
      %286 = vector.shape_cast %285 : vector<1x8x4xbf16> to vector<8x4xbf16>
      %287 = vector.shape_cast %284 : vector<8x4xbf16> to vector<1x8x4xbf16>
      tpu.vector_store %arg16[%c4_197, %c0_198, %c0_199], %287 {strides = array<i32>} : memref<8x8x4xbf16, #tpu.memory_space<vmem>>, vector<1x8x4xbf16>,
      %288 = vector.extract_strided_slice %251 {offsets = [0, 16], sizes = [8, 4], strides = [1, 1]} : vector<8x32xbf16> to vector<8x4xbf16>
      %c4_200 = arith.constant 4 : index
      %c0_201 = arith.constant 0 : index
      %c0_202 = arith.constant 0 : index
      %289 = vector.load %arg17[%c4_200, %c0_201, %c0_202] : memref<8x8x4xbf16, #tpu.memory_space<vmem>>, vector<1x8x4xbf16>
      %290 = vector.shape_cast %289 : vector<1x8x4xbf16> to vector<8x4xbf16>
      %291 = vector.shape_cast %288 : vector<8x4xbf16> to vector<1x8x4xbf16>
      tpu.vector_store %arg17[%c4_200, %c0_201, %c0_202], %291 {strides = array<i32>} : memref<8x8x4xbf16, #tpu.memory_space<vmem>>, vector<1x8x4xbf16>,
      %292 = vector.extract_strided_slice %250 {offsets = [0, 20], sizes = [8, 4], strides = [1, 1]} : vector<8x32xbf16> to vector<8x4xbf16>
      %c5_203 = arith.constant 5 : index
      %c0_204 = arith.constant 0 : index
      %c0_205 = arith.constant 0 : index
      %293 = vector.load %arg16[%c5_203, %c0_204, %c0_205] : memref<8x8x4xbf16, #tpu.memory_space<vmem>>, vector<1x8x4xbf16>
      %294 = vector.shape_cast %293 : vector<1x8x4xbf16> to vector<8x4xbf16>
      %295 = vector.shape_cast %292 : vector<8x4xbf16> to vector<1x8x4xbf16>
      tpu.vector_store %arg16[%c5_203, %c0_204, %c0_205], %295 {strides = array<i32>} : memref<8x8x4xbf16, #tpu.memory_space<vmem>>, vector<1x8x4xbf16>,
      %296 = vector.extract_strided_slice %251 {offsets = [0, 20], sizes = [8, 4], strides = [1, 1]} : vector<8x32xbf16> to vector<8x4xbf16>
      %c5_206 = arith.constant 5 : index
      %c0_207 = arith.constant 0 : index
      %c0_208 = arith.constant 0 : index
      %297 = vector.load %arg17[%c5_206, %c0_207, %c0_208] : memref<8x8x4xbf16, #tpu.memory_space<vmem>>, vector<1x8x4xbf16>
      %298 = vector.shape_cast %297 : vector<1x8x4xbf16> to vector<8x4xbf16>
      %299 = vector.shape_cast %296 : vector<8x4xbf16> to vector<1x8x4xbf16>
      tpu.vector_store %arg17[%c5_206, %c0_207, %c0_208], %299 {strides = array<i32>} : memref<8x8x4xbf16, #tpu.memory_space<vmem>>, vector<1x8x4xbf16>,
      %300 = vector.extract_strided_slice %250 {offsets = [0, 24], sizes = [8, 4], strides = [1, 1]} : vector<8x32xbf16> to vector<8x4xbf16>
      %c6_209 = arith.constant 6 : index
      %c0_210 = arith.constant 0 : index
      %c0_211 = arith.constant 0 : index
      %301 = vector.load %arg16[%c6_209, %c0_210, %c0_211] : memref<8x8x4xbf16, #tpu.memory_space<vmem>>, vector<1x8x4xbf16>
      %302 = vector.shape_cast %301 : vector<1x8x4xbf16> to vector<8x4xbf16>
      %303 = vector.shape_cast %300 : vector<8x4xbf16> to vector<1x8x4xbf16>
      tpu.vector_store %arg16[%c6_209, %c0_210, %c0_211], %303 {strides = array<i32>} : memref<8x8x4xbf16, #tpu.memory_space<vmem>>, vector<1x8x4xbf16>,
      %304 = vector.extract_strided_slice %251 {offsets = [0, 24], sizes = [8, 4], strides = [1, 1]} : vector<8x32xbf16> to vector<8x4xbf16>
      %c6_212 = arith.constant 6 : index
      %c0_213 = arith.constant 0 : index
      %c0_214 = arith.constant 0 : index
      %305 = vector.load %arg17[%c6_212, %c0_213, %c0_214] : memref<8x8x4xbf16, #tpu.memory_space<vmem>>, vector<1x8x4xbf16>
      %306 = vector.shape_cast %305 : vector<1x8x4xbf16> to vector<8x4xbf16>
      %307 = vector.shape_cast %304 : vector<8x4xbf16> to vector<1x8x4xbf16>
      tpu.vector_store %arg17[%c6_212, %c0_213, %c0_214], %307 {strides = array<i32>} : memref<8x8x4xbf16, #tpu.memory_space<vmem>>, vector<1x8x4xbf16>,
      %308 = vector.extract_strided_slice %250 {offsets = [0, 28], sizes = [8, 4], strides = [1, 1]} : vector<8x32xbf16> to vector<8x4xbf16>
      %c7_215 = arith.constant 7 : index
      %c0_216 = arith.constant 0 : index
      %c0_217 = arith.constant 0 : index
      %309 = vector.load %arg16[%c7_215, %c0_216, %c0_217] : memref<8x8x4xbf16, #tpu.memory_space<vmem>>, vector<1x8x4xbf16>
      %310 = vector.shape_cast %309 : vector<1x8x4xbf16> to vector<8x4xbf16>
      %311 = vector.shape_cast %308 : vector<8x4xbf16> to vector<1x8x4xbf16>
      tpu.vector_store %arg16[%c7_215, %c0_216, %c0_217], %311 {strides = array<i32>} : memref<8x8x4xbf16, #tpu.memory_space<vmem>>, vector<1x8x4xbf16>,
      %312 = vector.extract_strided_slice %251 {offsets = [0, 28], sizes = [8, 4], strides = [1, 1]} : vector<8x32xbf16> to vector<8x4xbf16>
      %c7_218 = arith.constant 7 : index
      %c0_219 = arith.constant 0 : index
      %c0_220 = arith.constant 0 : index
      %313 = vector.load %arg17[%c7_218, %c0_219, %c0_220] : memref<8x8x4xbf16, #tpu.memory_space<vmem>>, vector<1x8x4xbf16>
      %314 = vector.shape_cast %313 : vector<1x8x4xbf16> to vector<8x4xbf16>
      %315 = vector.shape_cast %312 : vector<8x4xbf16> to vector<1x8x4xbf16>
      tpu.vector_store %arg17[%c7_218, %c0_219, %c0_220], %315 {strides = array<i32>} : memref<8x8x4xbf16, #tpu.memory_space<vmem>>, vector<1x8x4xbf16>,
    } else {
    }
    %c8_i32 = arith.constant 8 : i32
    %3 = arith.muli %arg1, %c8_i32 : i32
    %4 = tpu.assume_multiple %3, 8 : i32
    %c0 = arith.constant 0 : index
    %5 = arith.index_cast %4 : i32 to index
    %c0_1 = arith.constant 0 : index
    %6 = vector.load %arg2[%c0, %5, %c0_1] : memref<1x16x32xbf16, #tpu.memory_space<vmem>>, vector<1x8x32xbf16>
    %7 = vector.shape_cast %6 : vector<1x8x32xbf16> to vector<8x32xbf16>
    %c0_2 = arith.constant 0 : index
    %c0_3 = arith.constant 0 : index
    %c0_4 = arith.constant 0 : index
    %8 = vector.load %arg3[%c0_2, %c0_3, %c0_4] : memref<8x32x4xbf16, #tpu.memory_space<vmem>>, vector<1x32x4xbf16>
    %9 = vector.shape_cast %8 : vector<1x32x4xbf16> to vector<32x4xbf16>
    %cst = arith.constant dense<0.000000e+00> : vector<8x4xf32>
    %10 = tpu.matmul %7, %9, %cst {dimension_numbers = #tpu.dot_dimension_numbers<[1], [0], [0], [1], [0, 0, 1, 1], [], []>} : vector<8x32xbf16>, vector<32x4xbf16>, vector<8x4xf32> -> vector<8x4xf32>
    %c0_5 = arith.constant 0 : index
    %c0_6 = arith.constant 0 : index
    %c0_7 = arith.constant 0 : index
    %11 = vector.load %arg4[%c0_5, %c0_6, %c0_7] : memref<8x1x4xf32, #tpu.memory_space<vmem>>, vector<1x1x4xf32>
    %12 = vector.shape_cast %11 : vector<1x1x4xf32> to vector<1x4xf32>
    %13 = vector.broadcast %12 : vector<1x4xf32> to vector<8x4xf32>
    %14 = arith.addf %10, %13 : vector<8x4xf32>
    %15 = arith.truncf %14 : vector<8x4xf32> to vector<8x4xbf16>
    %c0_8 = arith.constant 0 : index
    %c0_9 = arith.constant 0 : index
    %c0_10 = arith.constant 0 : index
    %16 = vector.load %arg16[%c0_8, %c0_9, %c0_10] : memref<8x8x4xbf16, #tpu.memory_space<vmem>>, vector<1x8x4xbf16>
    %17 = vector.shape_cast %16 : vector<1x8x4xbf16> to vector<8x4xbf16>
    %cst_11 = arith.constant dense<0.000000e+00> : vector<8x8xf32>
    %18 = tpu.matmul %15, %17, %cst_11 {dimension_numbers = #tpu.dot_dimension_numbers<[1], [1], [0], [0], [0, 0, 1, 0], [], []>} : vector<8x4xbf16>, vector<8x4xbf16>, vector<8x8xf32> -> vector<8x8xf32>
    %cst_12 = arith.constant dense<0xFF800000> : vector<8xf32>
    %19 = vector.multi_reduction <maximumf>, %18, %cst_12 [1] : vector<8x8xf32> to vector<8xf32>
    %20 = vector.shape_cast %19 : vector<8xf32> to vector<8x1xf32>
    %21 = vector.broadcast %20 : vector<8x1xf32> to vector<8x8xf32>
    %22 = arith.subf %18, %21 : vector<8x8xf32>
    %23 = math.exp %22 : vector<8x8xf32>
    %cst_13 = arith.constant dense<0.000000e+00> : vector<8xf32>
    %24 = vector.multi_reduction <add>, %23, %cst_13 [1] : vector<8x8xf32> to vector<8xf32>
    %25 = vector.shape_cast %24 : vector<8xf32> to vector<8x1xf32>
    %26 = tpu.reciprocal %25 {approx = true} : vector<8x1xf32> -> vector<8x1xf32>
    %27 = vector.broadcast %26 : vector<8x1xf32> to vector<8x8xf32>
    %28 = arith.mulf %23, %27 : vector<8x8xf32>
    %29 = arith.truncf %28 : vector<8x8xf32> to vector<8x8xbf16>
    %c0_14 = arith.constant 0 : index
    %c0_15 = arith.constant 0 : index
    %c0_16 = arith.constant 0 : index
    %30 = vector.load %arg17[%c0_14, %c0_15, %c0_16] : memref<8x8x4xbf16, #tpu.memory_space<vmem>>, vector<1x8x4xbf16>
    %31 = vector.shape_cast %30 : vector<1x8x4xbf16> to vector<8x4xbf16>
    %cst_17 = arith.constant dense<0.000000e+00> : vector<8x4xf32>
    %32 = tpu.matmul %29, %31, %cst_17 {dimension_numbers = #tpu.dot_dimension_numbers<[1], [0], [0], [1], [0, 0, 1, 1], [], []>} : vector<8x8xbf16>, vector<8x4xbf16>, vector<8x4xf32> -> vector<8x4xf32>
    %c0_18 = arith.constant 0 : index
    %c0_19 = arith.constant 0 : index
    %33 = vector.load %arg18[%c0_18, %c0_19] : memref<8x32xf32, #tpu.memory_space<vmem>>, vector<8x4xf32>
    tpu.vector_store %arg18[%c0_18, %c0_19], %32 {strides = array<i32>} : memref<8x32xf32, #tpu.memory_space<vmem>>, vector<8x4xf32>,
    %c1 = arith.constant 1 : index
    %c0_20 = arith.constant 0 : index
    %c0_21 = arith.constant 0 : index
    %34 = vector.load %arg3[%c1, %c0_20, %c0_21] : memref<8x32x4xbf16, #tpu.memory_space<vmem>>, vector<1x32x4xbf16>
    %35 = vector.shape_cast %34 : vector<1x32x4xbf16> to vector<32x4xbf16>
    %cst_22 = arith.constant dense<0.000000e+00> : vector<8x4xf32>
    %36 = tpu.matmul %7, %35, %cst_22 {dimension_numbers = #tpu.dot_dimension_numbers<[1], [0], [0], [1], [0, 0, 1, 1], [], []>} : vector<8x32xbf16>, vector<32x4xbf16>, vector<8x4xf32> -> vector<8x4xf32>
    %c1_23 = arith.constant 1 : index
    %c0_24 = arith.constant 0 : index
    %c0_25 = arith.constant 0 : index
    %37 = vector.load %arg4[%c1_23, %c0_24, %c0_25] : memref<8x1x4xf32, #tpu.memory_space<vmem>>, vector<1x1x4xf32>
    %38 = vector.shape_cast %37 : vector<1x1x4xf32> to vector<1x4xf32>
    %39 = vector.broadcast %38 : vector<1x4xf32> to vector<8x4xf32>
    %40 = arith.addf %36, %39 : vector<8x4xf32>
    %41 = arith.truncf %40 : vector<8x4xf32> to vector<8x4xbf16>
    %c1_26 = arith.constant 1 : index
    %c0_27 = arith.constant 0 : index
    %c0_28 = arith.constant 0 : index
    %42 = vector.load %arg16[%c1_26, %c0_27, %c0_28] : memref<8x8x4xbf16, #tpu.memory_space<vmem>>, vector<1x8x4xbf16>
    %43 = vector.shape_cast %42 : vector<1x8x4xbf16> to vector<8x4xbf16>
    %cst_29 = arith.constant dense<0.000000e+00> : vector<8x8xf32>
    %44 = tpu.matmul %41, %43, %cst_29 {dimension_numbers = #tpu.dot_dimension_numbers<[1], [1], [0], [0], [0, 0, 1, 0], [], []>} : vector<8x4xbf16>, vector<8x4xbf16>, vector<8x8xf32> -> vector<8x8xf32>
    %cst_30 = arith.constant dense<0xFF800000> : vector<8xf32>
    %45 = vector.multi_reduction <maximumf>, %44, %cst_30 [1] : vector<8x8xf32> to vector<8xf32>
    %46 = vector.shape_cast %45 : vector<8xf32> to vector<8x1xf32>
    %47 = vector.broadcast %46 : vector<8x1xf32> to vector<8x8xf32>
    %48 = arith.subf %44, %47 : vector<8x8xf32>
    %49 = math.exp %48 : vector<8x8xf32>
    %cst_31 = arith.constant dense<0.000000e+00> : vector<8xf32>
    %50 = vector.multi_reduction <add>, %49, %cst_31 [1] : vector<8x8xf32> to vector<8xf32>
    %51 = vector.shape_cast %50 : vector<8xf32> to vector<8x1xf32>
    %52 = tpu.reciprocal %51 {approx = true} : vector<8x1xf32> -> vector<8x1xf32>
    %53 = vector.broadcast %52 : vector<8x1xf32> to vector<8x8xf32>
    %54 = arith.mulf %49, %53 : vector<8x8xf32>
    %55 = arith.truncf %54 : vector<8x8xf32> to vector<8x8xbf16>
    %c1_32 = arith.constant 1 : index
    %c0_33 = arith.constant 0 : index
    %c0_34 = arith.constant 0 : index
    %56 = vector.load %arg17[%c1_32, %c0_33, %c0_34] : memref<8x8x4xbf16, #tpu.memory_space<vmem>>, vector<1x8x4xbf16>
    %57 = vector.shape_cast %56 : vector<1x8x4xbf16> to vector<8x4xbf16>
    %cst_35 = arith.constant dense<0.000000e+00> : vector<8x4xf32>
    %58 = tpu.matmul %55, %57, %cst_35 {dimension_numbers = #tpu.dot_dimension_numbers<[1], [0], [0], [1], [0, 0, 1, 1], [], []>} : vector<8x8xbf16>, vector<8x4xbf16>, vector<8x4xf32> -> vector<8x4xf32>
    %c0_36 = arith.constant 0 : index
    %c4 = arith.constant 4 : index
    %59 = vector.load %arg18[%c0_36, %c4] : memref<8x32xf32, #tpu.memory_space<vmem>>, vector<8x4xf32>
    tpu.vector_store %arg18[%c0_36, %c4], %58 {strides = array<i32>} : memref<8x32xf32, #tpu.memory_space<vmem>>, vector<8x4xf32>,
    %c2 = arith.constant 2 : index
    %c0_37 = arith.constant 0 : index
    %c0_38 = arith.constant 0 : index
    %60 = vector.load %arg3[%c2, %c0_37, %c0_38] : memref<8x32x4xbf16, #tpu.memory_space<vmem>>, vector<1x32x4xbf16>
    %61 = vector.shape_cast %60 : vector<1x32x4xbf16> to vector<32x4xbf16>
    %cst_39 = arith.constant dense<0.000000e+00> : vector<8x4xf32>
    %62 = tpu.matmul %7, %61, %cst_39 {dimension_numbers = #tpu.dot_dimension_numbers<[1], [0], [0], [1], [0, 0, 1, 1], [], []>} : vector<8x32xbf16>, vector<32x4xbf16>, vector<8x4xf32> -> vector<8x4xf32>
    %c2_40 = arith.constant 2 : index
    %c0_41 = arith.constant 0 : index
    %c0_42 = arith.constant 0 : index
    %63 = vector.load %arg4[%c2_40, %c0_41, %c0_42] : memref<8x1x4xf32, #tpu.memory_space<vmem>>, vector<1x1x4xf32>
    %64 = vector.shape_cast %63 : vector<1x1x4xf32> to vector<1x4xf32>
    %65 = vector.broadcast %64 : vector<1x4xf32> to vector<8x4xf32>
    %66 = arith.addf %62, %65 : vector<8x4xf32>
    %67 = arith.truncf %66 : vector<8x4xf32> to vector<8x4xbf16>
    %c2_43 = arith.constant 2 : index
    %c0_44 = arith.constant 0 : index
    %c0_45 = arith.constant 0 : index
    %68 = vector.load %arg16[%c2_43, %c0_44, %c0_45] : memref<8x8x4xbf16, #tpu.memory_space<vmem>>, vector<1x8x4xbf16>
    %69 = vector.shape_cast %68 : vector<1x8x4xbf16> to vector<8x4xbf16>
    %cst_46 = arith.constant dense<0.000000e+00> : vector<8x8xf32>
    %70 = tpu.matmul %67, %69, %cst_46 {dimension_numbers = #tpu.dot_dimension_numbers<[1], [1], [0], [0], [0, 0, 1, 0], [], []>} : vector<8x4xbf16>, vector<8x4xbf16>, vector<8x8xf32> -> vector<8x8xf32>
    %cst_47 = arith.constant dense<0xFF800000> : vector<8xf32>
    %71 = vector.multi_reduction <maximumf>, %70, %cst_47 [1] : vector<8x8xf32> to vector<8xf32>
    %72 = vector.shape_cast %71 : vector<8xf32> to vector<8x1xf32>
    %73 = vector.broadcast %72 : vector<8x1xf32> to vector<8x8xf32>
    %74 = arith.subf %70, %73 : vector<8x8xf32>
    %75 = math.exp %74 : vector<8x8xf32>
    %cst_48 = arith.constant dense<0.000000e+00> : vector<8xf32>
    %76 = vector.multi_reduction <add>, %75, %cst_48 [1] : vector<8x8xf32> to vector<8xf32>
    %77 = vector.shape_cast %76 : vector<8xf32> to vector<8x1xf32>
    %78 = tpu.reciprocal %77 {approx = true} : vector<8x1xf32> -> vector<8x1xf32>
    %79 = vector.broadcast %78 : vector<8x1xf32> to vector<8x8xf32>
    %80 = arith.mulf %75, %79 : vector<8x8xf32>
    %81 = arith.truncf %80 : vector<8x8xf32> to vector<8x8xbf16>
    %c2_49 = arith.constant 2 : index
    %c0_50 = arith.constant 0 : index
    %c0_51 = arith.constant 0 : index
    %82 = vector.load %arg17[%c2_49, %c0_50, %c0_51] : memref<8x8x4xbf16, #tpu.memory_space<vmem>>, vector<1x8x4xbf16>
    %83 = vector.shape_cast %82 : vector<1x8x4xbf16> to vector<8x4xbf16>
    %cst_52 = arith.constant dense<0.000000e+00> : vector<8x4xf32>
    %84 = tpu.matmul %81, %83, %cst_52 {dimension_numbers = #tpu.dot_dimension_numbers<[1], [0], [0], [1], [0, 0, 1, 1], [], []>} : vector<8x8xbf16>, vector<8x4xbf16>, vector<8x4xf32> -> vector<8x4xf32>
    %c0_53 = arith.constant 0 : index
    %c8 = arith.constant 8 : index
    %85 = vector.load %arg18[%c0_53, %c8] : memref<8x32xf32, #tpu.memory_space<vmem>>, vector<8x4xf32>
    tpu.vector_store %arg18[%c0_53, %c8], %84 {strides = array<i32>} : memref<8x32xf32, #tpu.memory_space<vmem>>, vector<8x4xf32>,
    %c3 = arith.constant 3 : index
    %c0_54 = arith.constant 0 : index
    %c0_55 = arith.constant 0 : index
    %86 = vector.load %arg3[%c3, %c0_54, %c0_55] : memref<8x32x4xbf16, #tpu.memory_space<vmem>>, vector<1x32x4xbf16>
    %87 = vector.shape_cast %86 : vector<1x32x4xbf16> to vector<32x4xbf16>
    %cst_56 = arith.constant dense<0.000000e+00> : vector<8x4xf32>
    %88 = tpu.matmul %7, %87, %cst_56 {dimension_numbers = #tpu.dot_dimension_numbers<[1], [0], [0], [1], [0, 0, 1, 1], [], []>} : vector<8x32xbf16>, vector<32x4xbf16>, vector<8x4xf32> -> vector<8x4xf32>
    %c3_57 = arith.constant 3 : index
    %c0_58 = arith.constant 0 : index
    %c0_59 = arith.constant 0 : index
    %89 = vector.load %arg4[%c3_57, %c0_58, %c0_59] : memref<8x1x4xf32, #tpu.memory_space<vmem>>, vector<1x1x4xf32>
    %90 = vector.shape_cast %89 : vector<1x1x4xf32> to vector<1x4xf32>
    %91 = vector.broadcast %90 : vector<1x4xf32> to vector<8x4xf32>
    %92 = arith.addf %88, %91 : vector<8x4xf32>
    %93 = arith.truncf %92 : vector<8x4xf32> to vector<8x4xbf16>
    %c3_60 = arith.constant 3 : index
    %c0_61 = arith.constant 0 : index
    %c0_62 = arith.constant 0 : index
    %94 = vector.load %arg16[%c3_60, %c0_61, %c0_62] : memref<8x8x4xbf16, #tpu.memory_space<vmem>>, vector<1x8x4xbf16>
    %95 = vector.shape_cast %94 : vector<1x8x4xbf16> to vector<8x4xbf16>
    %cst_63 = arith.constant dense<0.000000e+00> : vector<8x8xf32>
    %96 = tpu.matmul %93, %95, %cst_63 {dimension_numbers = #tpu.dot_dimension_numbers<[1], [1], [0], [0], [0, 0, 1, 0], [], []>} : vector<8x4xbf16>, vector<8x4xbf16>, vector<8x8xf32> -> vector<8x8xf32>
    %cst_64 = arith.constant dense<0xFF800000> : vector<8xf32>
    %97 = vector.multi_reduction <maximumf>, %96, %cst_64 [1] : vector<8x8xf32> to vector<8xf32>
    %98 = vector.shape_cast %97 : vector<8xf32> to vector<8x1xf32>
    %99 = vector.broadcast %98 : vector<8x1xf32> to vector<8x8xf32>
    %100 = arith.subf %96, %99 : vector<8x8xf32>
    %101 = math.exp %100 : vector<8x8xf32>
    %cst_65 = arith.constant dense<0.000000e+00> : vector<8xf32>
    %102 = vector.multi_reduction <add>, %101, %cst_65 [1] : vector<8x8xf32> to vector<8xf32>
    %103 = vector.shape_cast %102 : vector<8xf32> to vector<8x1xf32>
    %104 = tpu.reciprocal %103 {approx = true} : vector<8x1xf32> -> vector<8x1xf32>
    %105 = vector.broadcast %104 : vector<8x1xf32> to vector<8x8xf32>
    %106 = arith.mulf %101, %105 : vector<8x8xf32>
    %107 = arith.truncf %106 : vector<8x8xf32> to vector<8x8xbf16>
    %c3_66 = arith.constant 3 : index
    %c0_67 = arith.constant 0 : index
    %c0_68 = arith.constant 0 : index
    %108 = vector.load %arg17[%c3_66, %c0_67, %c0_68] : memref<8x8x4xbf16, #tpu.memory_space<vmem>>, vector<1x8x4xbf16>
    %109 = vector.shape_cast %108 : vector<1x8x4xbf16> to vector<8x4xbf16>
    %cst_69 = arith.constant dense<0.000000e+00> : vector<8x4xf32>
    %110 = tpu.matmul %107, %109, %cst_69 {dimension_numbers = #tpu.dot_dimension_numbers<[1], [0], [0], [1], [0, 0, 1, 1], [], []>} : vector<8x8xbf16>, vector<8x4xbf16>, vector<8x4xf32> -> vector<8x4xf32>
    %c0_70 = arith.constant 0 : index
    %c12 = arith.constant 12 : index
    %111 = vector.load %arg18[%c0_70, %c12] : memref<8x32xf32, #tpu.memory_space<vmem>>, vector<8x4xf32>
    tpu.vector_store %arg18[%c0_70, %c12], %110 {strides = array<i32>} : memref<8x32xf32, #tpu.memory_space<vmem>>, vector<8x4xf32>,
    %c4_71 = arith.constant 4 : index
    %c0_72 = arith.constant 0 : index
    %c0_73 = arith.constant 0 : index
    %112 = vector.load %arg3[%c4_71, %c0_72, %c0_73] : memref<8x32x4xbf16, #tpu.memory_space<vmem>>, vector<1x32x4xbf16>
    %113 = vector.shape_cast %112 : vector<1x32x4xbf16> to vector<32x4xbf16>
    %cst_74 = arith.constant dense<0.000000e+00> : vector<8x4xf32>
    %114 = tpu.matmul %7, %113, %cst_74 {dimension_numbers = #tpu.dot_dimension_numbers<[1], [0], [0], [1], [0, 0, 1, 1], [], []>} : vector<8x32xbf16>, vector<32x4xbf16>, vector<8x4xf32> -> vector<8x4xf32>
    %c4_75 = arith.constant 4 : index
    %c0_76 = arith.constant 0 : index
    %c0_77 = arith.constant 0 : index
    %115 = vector.load %arg4[%c4_75, %c0_76, %c0_77] : memref<8x1x4xf32, #tpu.memory_space<vmem>>, vector<1x1x4xf32>
    %116 = vector.shape_cast %115 : vector<1x1x4xf32> to vector<1x4xf32>
    %117 = vector.broadcast %116 : vector<1x4xf32> to vector<8x4xf32>
    %118 = arith.addf %114, %117 : vector<8x4xf32>
    %119 = arith.truncf %118 : vector<8x4xf32> to vector<8x4xbf16>
    %c4_78 = arith.constant 4 : index
    %c0_79 = arith.constant 0 : index
    %c0_80 = arith.constant 0 : index
    %120 = vector.load %arg16[%c4_78, %c0_79, %c0_80] : memref<8x8x4xbf16, #tpu.memory_space<vmem>>, vector<1x8x4xbf16>
    %121 = vector.shape_cast %120 : vector<1x8x4xbf16> to vector<8x4xbf16>
    %cst_81 = arith.constant dense<0.000000e+00> : vector<8x8xf32>
    %122 = tpu.matmul %119, %121, %cst_81 {dimension_numbers = #tpu.dot_dimension_numbers<[1], [1], [0], [0], [0, 0, 1, 0], [], []>} : vector<8x4xbf16>, vector<8x4xbf16>, vector<8x8xf32> -> vector<8x8xf32>
    %cst_82 = arith.constant dense<0xFF800000> : vector<8xf32>
    %123 = vector.multi_reduction <maximumf>, %122, %cst_82 [1] : vector<8x8xf32> to vector<8xf32>
    %124 = vector.shape_cast %123 : vector<8xf32> to vector<8x1xf32>
    %125 = vector.broadcast %124 : vector<8x1xf32> to vector<8x8xf32>
    %126 = arith.subf %122, %125 : vector<8x8xf32>
    %127 = math.exp %126 : vector<8x8xf32>
    %cst_83 = arith.constant dense<0.000000e+00> : vector<8xf32>
    %128 = vector.multi_reduction <add>, %127, %cst_83 [1] : vector<8x8xf32> to vector<8xf32>
    %129 = vector.shape_cast %128 : vector<8xf32> to vector<8x1xf32>
    %130 = tpu.reciprocal %129 {approx = true} : vector<8x1xf32> -> vector<8x1xf32>
    %131 = vector.broadcast %130 : vector<8x1xf32> to vector<8x8xf32>
    %132 = arith.mulf %127, %131 : vector<8x8xf32>
    %133 = arith.truncf %132 : vector<8x8xf32> to vector<8x8xbf16>
    %c4_84 = arith.constant 4 : index
    %c0_85 = arith.constant 0 : index
    %c0_86 = arith.constant 0 : index
    %134 = vector.load %arg17[%c4_84, %c0_85, %c0_86] : memref<8x8x4xbf16, #tpu.memory_space<vmem>>, vector<1x8x4xbf16>
    %135 = vector.shape_cast %134 : vector<1x8x4xbf16> to vector<8x4xbf16>
    %cst_87 = arith.constant dense<0.000000e+00> : vector<8x4xf32>
    %136 = tpu.matmul %133, %135, %cst_87 {dimension_numbers = #tpu.dot_dimension_numbers<[1], [0], [0], [1], [0, 0, 1, 1], [], []>} : vector<8x8xbf16>, vector<8x4xbf16>, vector<8x4xf32> -> vector<8x4xf32>
    %c0_88 = arith.constant 0 : index
    %c16 = arith.constant 16 : index
    %137 = vector.load %arg18[%c0_88, %c16] : memref<8x32xf32, #tpu.memory_space<vmem>>, vector<8x4xf32>
    tpu.vector_store %arg18[%c0_88, %c16], %136 {strides = array<i32>} : memref<8x32xf32, #tpu.memory_space<vmem>>, vector<8x4xf32>,
    %c5 = arith.constant 5 : index
    %c0_89 = arith.constant 0 : index
    %c0_90 = arith.constant 0 : index
    %138 = vector.load %arg3[%c5, %c0_89, %c0_90] : memref<8x32x4xbf16, #tpu.memory_space<vmem>>, vector<1x32x4xbf16>
    %139 = vector.shape_cast %138 : vector<1x32x4xbf16> to vector<32x4xbf16>
    %cst_91 = arith.constant dense<0.000000e+00> : vector<8x4xf32>
    %140 = tpu.matmul %7, %139, %cst_91 {dimension_numbers = #tpu.dot_dimension_numbers<[1], [0], [0], [1], [0, 0, 1, 1], [], []>} : vector<8x32xbf16>, vector<32x4xbf16>, vector<8x4xf32> -> vector<8x4xf32>
    %c5_92 = arith.constant 5 : index
    %c0_93 = arith.constant 0 : index
    %c0_94 = arith.constant 0 : index
    %141 = vector.load %arg4[%c5_92, %c0_93, %c0_94] : memref<8x1x4xf32, #tpu.memory_space<vmem>>, vector<1x1x4xf32>
    %142 = vector.shape_cast %141 : vector<1x1x4xf32> to vector<1x4xf32>
    %143 = vector.broadcast %142 : vector<1x4xf32> to vector<8x4xf32>
    %144 = arith.addf %140, %143 : vector<8x4xf32>
    %145 = arith.truncf %144 : vector<8x4xf32> to vector<8x4xbf16>
    %c5_95 = arith.constant 5 : index
    %c0_96 = arith.constant 0 : index
    %c0_97 = arith.constant 0 : index
    %146 = vector.load %arg16[%c5_95, %c0_96, %c0_97] : memref<8x8x4xbf16, #tpu.memory_space<vmem>>, vector<1x8x4xbf16>
    %147 = vector.shape_cast %146 : vector<1x8x4xbf16> to vector<8x4xbf16>
    %cst_98 = arith.constant dense<0.000000e+00> : vector<8x8xf32>
    %148 = tpu.matmul %145, %147, %cst_98 {dimension_numbers = #tpu.dot_dimension_numbers<[1], [1], [0], [0], [0, 0, 1, 0], [], []>} : vector<8x4xbf16>, vector<8x4xbf16>, vector<8x8xf32> -> vector<8x8xf32>
    %cst_99 = arith.constant dense<0xFF800000> : vector<8xf32>
    %149 = vector.multi_reduction <maximumf>, %148, %cst_99 [1] : vector<8x8xf32> to vector<8xf32>
    %150 = vector.shape_cast %149 : vector<8xf32> to vector<8x1xf32>
    %151 = vector.broadcast %150 : vector<8x1xf32> to vector<8x8xf32>
    %152 = arith.subf %148, %151 : vector<8x8xf32>
    %153 = math.exp %152 : vector<8x8xf32>
    %cst_100 = arith.constant dense<0.000000e+00> : vector<8xf32>
    %154 = vector.multi_reduction <add>, %153, %cst_100 [1] : vector<8x8xf32> to vector<8xf32>
    %155 = vector.shape_cast %154 : vector<8xf32> to vector<8x1xf32>
    %156 = tpu.reciprocal %155 {approx = true} : vector<8x1xf32> -> vector<8x1xf32>
    %157 = vector.broadcast %156 : vector<8x1xf32> to vector<8x8xf32>
    %158 = arith.mulf %153, %157 : vector<8x8xf32>
    %159 = arith.truncf %158 : vector<8x8xf32> to vector<8x8xbf16>
    %c5_101 = arith.constant 5 : index
    %c0_102 = arith.constant 0 : index
    %c0_103 = arith.constant 0 : index
    %160 = vector.load %arg17[%c5_101, %c0_102, %c0_103] : memref<8x8x4xbf16, #tpu.memory_space<vmem>>, vector<1x8x4xbf16>
    %161 = vector.shape_cast %160 : vector<1x8x4xbf16> to vector<8x4xbf16>
    %cst_104 = arith.constant dense<0.000000e+00> : vector<8x4xf32>
    %162 = tpu.matmul %159, %161, %cst_104 {dimension_numbers = #tpu.dot_dimension_numbers<[1], [0], [0], [1], [0, 0, 1, 1], [], []>} : vector<8x8xbf16>, vector<8x4xbf16>, vector<8x4xf32> -> vector<8x4xf32>
    %c0_105 = arith.constant 0 : index
    %c20 = arith.constant 20 : index
    %163 = vector.load %arg18[%c0_105, %c20] : memref<8x32xf32, #tpu.memory_space<vmem>>, vector<8x4xf32>
    tpu.vector_store %arg18[%c0_105, %c20], %162 {strides = array<i32>} : memref<8x32xf32, #tpu.memory_space<vmem>>, vector<8x4xf32>,
    %c6 = arith.constant 6 : index
    %c0_106 = arith.constant 0 : index
    %c0_107 = arith.constant 0 : index
    %164 = vector.load %arg3[%c6, %c0_106, %c0_107] : memref<8x32x4xbf16, #tpu.memory_space<vmem>>, vector<1x32x4xbf16>
    %165 = vector.shape_cast %164 : vector<1x32x4xbf16> to vector<32x4xbf16>
    %cst_108 = arith.constant dense<0.000000e+00> : vector<8x4xf32>
    %166 = tpu.matmul %7, %165, %cst_108 {dimension_numbers = #tpu.dot_dimension_numbers<[1], [0], [0], [1], [0, 0, 1, 1], [], []>} : vector<8x32xbf16>, vector<32x4xbf16>, vector<8x4xf32> -> vector<8x4xf32>
    %c6_109 = arith.constant 6 : index
    %c0_110 = arith.constant 0 : index
    %c0_111 = arith.constant 0 : index
    %167 = vector.load %arg4[%c6_109, %c0_110, %c0_111] : memref<8x1x4xf32, #tpu.memory_space<vmem>>, vector<1x1x4xf32>
    %168 = vector.shape_cast %167 : vector<1x1x4xf32> to vector<1x4xf32>
    %169 = vector.broadcast %168 : vector<1x4xf32> to vector<8x4xf32>
    %170 = arith.addf %166, %169 : vector<8x4xf32>
    %171 = arith.truncf %170 : vector<8x4xf32> to vector<8x4xbf16>
    %c6_112 = arith.constant 6 : index
    %c0_113 = arith.constant 0 : index
    %c0_114 = arith.constant 0 : index
    %172 = vector.load %arg16[%c6_112, %c0_113, %c0_114] : memref<8x8x4xbf16, #tpu.memory_space<vmem>>, vector<1x8x4xbf16>
    %173 = vector.shape_cast %172 : vector<1x8x4xbf16> to vector<8x4xbf16>
    %cst_115 = arith.constant dense<0.000000e+00> : vector<8x8xf32>
    %174 = tpu.matmul %171, %173, %cst_115 {dimension_numbers = #tpu.dot_dimension_numbers<[1], [1], [0], [0], [0, 0, 1, 0], [], []>} : vector<8x4xbf16>, vector<8x4xbf16>, vector<8x8xf32> -> vector<8x8xf32>
    %cst_116 = arith.constant dense<0xFF800000> : vector<8xf32>
    %175 = vector.multi_reduction <maximumf>, %174, %cst_116 [1] : vector<8x8xf32> to vector<8xf32>
    %176 = vector.shape_cast %175 : vector<8xf32> to vector<8x1xf32>
    %177 = vector.broadcast %176 : vector<8x1xf32> to vector<8x8xf32>
    %178 = arith.subf %174, %177 : vector<8x8xf32>
    %179 = math.exp %178 : vector<8x8xf32>
    %cst_117 = arith.constant dense<0.000000e+00> : vector<8xf32>
    %180 = vector.multi_reduction <add>, %179, %cst_117 [1] : vector<8x8xf32> to vector<8xf32>
    %181 = vector.shape_cast %180 : vector<8xf32> to vector<8x1xf32>
    %182 = tpu.reciprocal %181 {approx = true} : vector<8x1xf32> -> vector<8x1xf32>
    %183 = vector.broadcast %182 : vector<8x1xf32> to vector<8x8xf32>
    %184 = arith.mulf %179, %183 : vector<8x8xf32>
    %185 = arith.truncf %184 : vector<8x8xf32> to vector<8x8xbf16>
    %c6_118 = arith.constant 6 : index
    %c0_119 = arith.constant 0 : index
    %c0_120 = arith.constant 0 : index
    %186 = vector.load %arg17[%c6_118, %c0_119, %c0_120] : memref<8x8x4xbf16, #tpu.memory_space<vmem>>, vector<1x8x4xbf16>
    %187 = vector.shape_cast %186 : vector<1x8x4xbf16> to vector<8x4xbf16>
    %cst_121 = arith.constant dense<0.000000e+00> : vector<8x4xf32>
    %188 = tpu.matmul %185, %187, %cst_121 {dimension_numbers = #tpu.dot_dimension_numbers<[1], [0], [0], [1], [0, 0, 1, 1], [], []>} : vector<8x8xbf16>, vector<8x4xbf16>, vector<8x4xf32> -> vector<8x4xf32>
    %c0_122 = arith.constant 0 : index
    %c24 = arith.constant 24 : index
    %189 = vector.load %arg18[%c0_122, %c24] : memref<8x32xf32, #tpu.memory_space<vmem>>, vector<8x4xf32>
    tpu.vector_store %arg18[%c0_122, %c24], %188 {strides = array<i32>} : memref<8x32xf32, #tpu.memory_space<vmem>>, vector<8x4xf32>,
    %c7 = arith.constant 7 : index
    %c0_123 = arith.constant 0 : index
    %c0_124 = arith.constant 0 : index
    %190 = vector.load %arg3[%c7, %c0_123, %c0_124] : memref<8x32x4xbf16, #tpu.memory_space<vmem>>, vector<1x32x4xbf16>
    %191 = vector.shape_cast %190 : vector<1x32x4xbf16> to vector<32x4xbf16>
    %cst_125 = arith.constant dense<0.000000e+00> : vector<8x4xf32>
    %192 = tpu.matmul %7, %191, %cst_125 {dimension_numbers = #tpu.dot_dimension_numbers<[1], [0], [0], [1], [0, 0, 1, 1], [], []>} : vector<8x32xbf16>, vector<32x4xbf16>, vector<8x4xf32> -> vector<8x4xf32>
    %c7_126 = arith.constant 7 : index
    %c0_127 = arith.constant 0 : index
    %c0_128 = arith.constant 0 : index
    %193 = vector.load %arg4[%c7_126, %c0_127, %c0_128] : memref<8x1x4xf32, #tpu.memory_space<vmem>>, vector<1x1x4xf32>
    %194 = vector.shape_cast %193 : vector<1x1x4xf32> to vector<1x4xf32>
    %195 = vector.broadcast %194 : vector<1x4xf32> to vector<8x4xf32>
    %196 = arith.addf %192, %195 : vector<8x4xf32>
    %197 = arith.truncf %196 : vector<8x4xf32> to vector<8x4xbf16>
    %c7_129 = arith.constant 7 : index
    %c0_130 = arith.constant 0 : index
    %c0_131 = arith.constant 0 : index
    %198 = vector.load %arg16[%c7_129, %c0_130, %c0_131] : memref<8x8x4xbf16, #tpu.memory_space<vmem>>, vector<1x8x4xbf16>
    %199 = vector.shape_cast %198 : vector<1x8x4xbf16> to vector<8x4xbf16>
    %cst_132 = arith.constant dense<0.000000e+00> : vector<8x8xf32>
    %200 = tpu.matmul %197, %199, %cst_132 {dimension_numbers = #tpu.dot_dimension_numbers<[1], [1], [0], [0], [0, 0, 1, 0], [], []>} : vector<8x4xbf16>, vector<8x4xbf16>, vector<8x8xf32> -> vector<8x8xf32>
    %cst_133 = arith.constant dense<0xFF800000> : vector<8xf32>
    %201 = vector.multi_reduction <maximumf>, %200, %cst_133 [1] : vector<8x8xf32> to vector<8xf32>
    %202 = vector.shape_cast %201 : vector<8xf32> to vector<8x1xf32>
    %203 = vector.broadcast %202 : vector<8x1xf32> to vector<8x8xf32>
    %204 = arith.subf %200, %203 : vector<8x8xf32>
    %205 = math.exp %204 : vector<8x8xf32>
    %cst_134 = arith.constant dense<0.000000e+00> : vector<8xf32>
    %206 = vector.multi_reduction <add>, %205, %cst_134 [1] : vector<8x8xf32> to vector<8xf32>
    %207 = vector.shape_cast %206 : vector<8xf32> to vector<8x1xf32>
    %208 = tpu.reciprocal %207 {approx = true} : vector<8x1xf32> -> vector<8x1xf32>
    %209 = vector.broadcast %208 : vector<8x1xf32> to vector<8x8xf32>
    %210 = arith.mulf %205, %209 : vector<8x8xf32>
    %211 = arith.truncf %210 : vector<8x8xf32> to vector<8x8xbf16>
    %c7_135 = arith.constant 7 : index
    %c0_136 = arith.constant 0 : index
    %c0_137 = arith.constant 0 : index
    %212 = vector.load %arg17[%c7_135, %c0_136, %c0_137] : memref<8x8x4xbf16, #tpu.memory_space<vmem>>, vector<1x8x4xbf16>
    %213 = vector.shape_cast %212 : vector<1x8x4xbf16> to vector<8x4xbf16>
    %cst_138 = arith.constant dense<0.000000e+00> : vector<8x4xf32>
    %214 = tpu.matmul %211, %213, %cst_138 {dimension_numbers = #tpu.dot_dimension_numbers<[1], [0], [0], [1], [0, 0, 1, 1], [], []>} : vector<8x8xbf16>, vector<8x4xbf16>, vector<8x4xf32> -> vector<8x4xf32>
    %c0_139 = arith.constant 0 : index
    %c28 = arith.constant 28 : index
    %215 = vector.load %arg18[%c0_139, %c28] : memref<8x32xf32, #tpu.memory_space<vmem>>, vector<8x4xf32>
    tpu.vector_store %arg18[%c0_139, %c28], %214 {strides = array<i32>} : memref<8x32xf32, #tpu.memory_space<vmem>>, vector<8x4xf32>,
    %c0_140 = arith.constant 0 : index
    %c0_141 = arith.constant 0 : index
    %216 = vector.load %arg18[%c0_140, %c0_141] : memref<8x32xf32, #tpu.memory_space<vmem>>, vector<8x32xf32>
    %217 = arith.truncf %216 : vector<8x32xf32> to vector<8x32xbf16>
    %c0_142 = arith.constant 0 : index
    %c0_143 = arith.constant 0 : index
    %218 = vector.load %arg13[%c0_142, %c0_143] : memref<32x32xbf16, #tpu.memory_space<vmem>>, vector<32x32xbf16>
    %cst_144 = arith.constant dense<0.000000e+00> : vector<8x32xf32>
    %219 = tpu.matmul %217, %218, %cst_144 {dimension_numbers = #tpu.dot_dimension_numbers<[1], [0], [0], [1], [0, 0, 1, 1], [], []>} : vector<8x32xbf16>, vector<32x32xbf16>, vector<8x32xf32> -> vector<8x32xf32>
    %c0_145 = arith.constant 0 : index
    %c0_146 = arith.constant 0 : index
    %220 = vector.load %arg14[%c0_145, %c0_146] : memref<1x32xf32, #tpu.memory_space<vmem>>, vector<1x32xf32>
    %221 = vector.broadcast %220 : vector<1x32xf32> to vector<8x32xf32>
    %222 = arith.addf %219, %221 : vector<8x32xf32>
    %c0_147 = arith.constant 0 : index
    %c0_148 = arith.constant 0 : index
    %c0_149 = arith.constant 0 : index
    %223 = vector.load %arg15[%c0_147, %c0_148, %c0_149] : memref<1x8x32xf32, #tpu.memory_space<vmem>>, vector<1x8x32xf32>
    %224 = vector.shape_cast %223 : vector<1x8x32xf32> to vector<8x32xf32>
    %225 = vector.shape_cast %222 : vector<8x32xf32> to vector<1x8x32xf32>
    tpu.vector_store %arg15[%c0_147, %c0_148, %c0_149], %225 {strides = array<i32>} : memref<1x8x32xf32, #tpu.memory_space<vmem>>, vector<1x8x32xf32>,
    return
  }
  func.func @transform_0(%arg0: i32, %arg1: i32) -> (i32, i32, i32) {
    %c0_i32 = arith.constant 0 : i32
    %c0_i32_0 = arith.constant 0 : i32
    %c0_i32_1 = arith.constant 0 : i32
    return %arg0, %c0_i32, %c0_i32_0 : i32, i32, i32
  }
  func.func @transform_1(%arg0: i32, %arg1: i32) -> (i32, i32, i32) {
    %c0_i32 = arith.constant 0 : i32
    %c0_i32_0 = arith.constant 0 : i32
    %c0_i32_1 = arith.constant 0 : i32
    %c0_i32_2 = arith.constant 0 : i32
    return %c0_i32, %c0_i32_0, %c0_i32_1 : i32, i32, i32
  }
  func.func @transform_2(%arg0: i32, %arg1: i32) -> (i32, i32, i32) {
    %c0_i32 = arith.constant 0 : i32
    %c0_i32_0 = arith.constant 0 : i32
    %c0_i32_1 = arith.constant 0 : i32
    %c0_i32_2 = arith.constant 0 : i32
    return %c0_i32, %c0_i32_0, %c0_i32_1 : i32, i32, i32
  }
  func.func @transform_3(%arg0: i32, %arg1: i32) -> (i32, i32) {
    %c0_i32 = arith.constant 0 : i32
    %c0_i32_0 = arith.constant 0 : i32
    %c0_i32_1 = arith.constant 0 : i32
    return %c0_i32, %c0_i32_0 : i32, i32
  }
  func.func @transform_4(%arg0: i32, %arg1: i32) -> (i32, i32) {
    %c0_i32 = arith.constant 0 : i32
    %c0_i32_0 = arith.constant 0 : i32
    %c0_i32_1 = arith.constant 0 : i32
    return %c0_i32, %c0_i32_0 : i32, i32
  }
  func.func @transform_5(%arg0: i32, %arg1: i32) -> (i32, i32) {
    %c0_i32 = arith.constant 0 : i32
    %c0_i32_0 = arith.constant 0 : i32
    %c0_i32_1 = arith.constant 0 : i32
    return %c0_i32, %c0_i32_0 : i32, i32
  }
  func.func @transform_6(%arg0: i32, %arg1: i32) -> (i32, i32) {
    %c0_i32 = arith.constant 0 : i32
    %c0_i32_0 = arith.constant 0 : i32
    %c0_i32_1 = arith.constant 0 : i32
    return %c0_i32, %c0_i32_0 : i32, i32
  }
  func.func @transform_7(%arg0: i32, %arg1: i32) -> (i32, i32) {
    %c0_i32 = arith.constant 0 : i32
    %c0_i32_0 = arith.constant 0 : i32
    %c0_i32_1 = arith.constant 0 : i32
    return %c0_i32, %c0_i32_0 : i32, i32
  }
  func.func @transform_8(%arg0: i32, %arg1: i32) -> (i32, i32) {
    %c0_i32 = arith.constant 0 : i32
    %c0_i32_0 = arith.constant 0 : i32
    %c0_i32_1 = arith.constant 0 : i32
    return %c0_i32, %c0_i32_0 : i32, i32
  }
  func.func @transform_9(%arg0: i32, %arg1: i32) -> (i32, i32) {
    %c0_i32 = arith.constant 0 : i32
    %c0_i32_0 = arith.constant 0 : i32
    %c0_i32_1 = arith.constant 0 : i32
    return %c0_i32, %c0_i32_0 : i32, i32
  }
  func.func @transform_10(%arg0: i32, %arg1: i32) -> (i32, i32) {
    %c0_i32 = arith.constant 0 : i32
    %c0_i32_0 = arith.constant 0 : i32
    %c0_i32_1 = arith.constant 0 : i32
    return %c0_i32, %c0_i32_0 : i32, i32
  }
  func.func @transform_11(%arg0: i32, %arg1: i32) -> (i32, i32) {
    %c0_i32 = arith.constant 0 : i32
    %c0_i32_0 = arith.constant 0 : i32
    %c0_i32_1 = arith.constant 0 : i32
    return %c0_i32, %c0_i32_0 : i32, i32
  }
  func.func @transform_12(%arg0: i32, %arg1: i32) -> (i32, i32) {
    %c0_i32 = arith.constant 0 : i32
    %c0_i32_0 = arith.constant 0 : i32
    %c0_i32_1 = arith.constant 0 : i32
    return %c0_i32, %c0_i32_0 : i32, i32
  }
  func.func @transform_13(%arg0: i32, %arg1: i32) -> (i32, i32, i32) {
    %c0_i32 = arith.constant 0 : i32
    %c0_i32_0 = arith.constant 0 : i32
    return %arg0, %arg1, %c0_i32 : i32, i32, i32
  }
}

</mosaic_0001>

<bundles_post_ra>
// kernel: tpu_custom_call.1
= control target key start
LH: loop header
LB: loop body
LE: loop exit
PB: predicated region body
PF: predicated region fallthrough
CT: control target
= control target key end

     0   :  { %s4714_s0 = inlined_call_operand.hbm [shape: bf16[2,16,32], index: 0, kind: input, shape index: {}]   ;;  %s4715_s1 = inlined_call_operand.hbm [shape: bf16[8,32,4], index: 1, kind: input, shape index: {}]   ;;  %s4716_s2 = inlined_call_operand.hbm [shape: f32[8,1,4], index: 2, kind: input, shape index: {}]   ;;  %s4717_s3 = inlined_call_operand.hbm [shape: bf16[32,32], index: 3, kind: input, shape index: {}]   ;;  %s4718_s4 = inlined_call_operand.hbm [shape: f32[1,32], index: 4, kind: input, shape index: {}]   ;;  %s4719_s5 = inlined_call_operand.hbm [shape: bf16[32,32], index: 5, kind: input, shape index: {}]   ;;  %s4720_s6 = inlined_call_operand.hbm [shape: f32[1,32], index: 6, kind: input, shape index: {}]   ;;  %s4721_s7 = inlined_call_operand.hbm [shape: bf16[8,16], index: 7, kind: input, shape index: {}]   ;;  %s4722_s8 = inlined_call_operand.hbm [shape: f32[8,1], index: 8, kind: input, shape index: {}]   ;;  %s4723_s9 = inlined_call_operand.hbm [shape: bf16[8,16], index: 9, kind: input, shape index: {}]   ;;  %s4724_s10 = inlined_call_operand.hbm [shape: f32[8,1], index: 10, kind: input, shape index: {}]   ;;  %s4725_s11 = inlined_call_operand.hbm [shape: bf16[32,32], index: 11, kind: input, shape index: {}]   ;;  %s4726_s12 = inlined_call_operand.hbm [shape: f32[1,32], index: 12, kind: input, shape index: {}]   ;;  %s4727_s13 = inlined_call_operand.hbm [shape: f32[2,16,32], index: 13, kind: output, shape index: {}]  }
   0x1   :  { %4746 = sst [smem:[#allocation45_spill]] %s4714_s0 }
   0x2   :  { %4747 = sst [smem:[#allocation46_spill]] %s4715_s1 }
   0x3   :  { %4748 = sst [smem:[#allocation47_spill]] %s4716_s2 }
   0x4   :  { %4749 = sst [smem:[#allocation48_spill]] %s4717_s3 }
   0x5   :  { %4750 = sst [smem:[#allocation49_spill]] %s4718_s4 }
   0x6   :  { %4751 = sst [smem:[#allocation50_spill]] %s4719_s5 }
   0x7   :  { %4752 = sst [smem:[#allocation51_spill]] %s4720_s6 }
   0x8   :  { %4753 = sst [smem:[#allocation52_spill]] %s4727_s13 }
   0x9   :  { %18 = vsyncpa [#allocation6], 0 }
   0xa   :  { %20 = vsyncpa [#allocation6 + $0x1], 0 }
   0xb   :  { %21 = vsyncpa [#allocation9], 0 }
   0xc   :  { %22 = vsyncpa [#allocation12], 0 }
   0xd   :  { %23 = vsyncpa [#allocation15], 0 }
   0xe   :  { %24 = vsyncpa [#allocation18], 0 }
   0xf   :  { %25 = vsyncpa [#allocation21], 0 }
  0x10   :  { %26 = vsyncpa [#allocation24], 0 }
  0x11   :  { %27 = vsyncpa [#allocation7], 0 }
  0x12   :  { %29 = vsyncpa [#allocation7 + $0x1], 0  ;;  %s3987_s25 = smov 0   ;;  %s3989_s26 = smov 0  }
  0x13   :  { %s3991_s27 = smov 0   ;;  %s3993_s28 = smov 0  }
  0x14   :  { %s3995_s29 = smov 0   ;;  %s3997_s30 = smov 0  }
  0x15   :  { %s3999_s14 = smov 0   ;;  %s4001_s15 = smov 0  }
  0x16   :  { %s4003_s16 = smov 0   ;;  %s4005_s17 = smov 0  }
  0x17   :  { %s4007_s18 = smov 0  }
  0x18 LB: > { %4754 = sst [smem:[#allocation35_spill]] %s3838_s25  ;;  %s4728_s19 = sadd.s32 4294967295, %s3878_s18   ;;  %s3878_s18 = sphi %s4007_s18, %s35_s18   ;;  %s3874_s17 = sphi %s4005_s17, %s4816_s17   ;;  %s3870_s16 = sphi %s4003_s16, %s4815_s16   ;;  %s3866_s15 = sphi %s4001_s15, %s4814_s15   ;;  %s3862_s14 = sphi %s3999_s14, %s4813_s14   ;;  %s3858_s30 = sphi %s3997_s30, %s4812_s30   ;;  %s3854_s29 = sphi %s3995_s29, %s4809_s29   ;;  %s3850_s28 = sphi %s3993_s28, %s4808_s28   ;;  %s3846_s27 = sphi %s3991_s27, %s4811_s27   ;;  %s3842_s26 = sphi %s3989_s26, %s4807_s26   ;;  %s3838_s25 = sphi %s3987_s25, %s4806_s25  }
  0x19   : > { %4755 = sst [smem:[#allocation36_spill]] %s3842_s26  ;;  %p2691_p0 = scmp.ge.s32.totalorder %s3878_s18, 1 }
  0x1a   : > { %4756 = sst [smem:[#allocation37_spill]] %s3846_s27  ;;  %p4046_p1 = scmp.eq.s32.totalorder %s4728_s19, 0 }
  0x1b   : > { %4757 = sst [smem:[#allocation38_spill]] %s3850_s28  ;;  %p358_p2 = scmp.lt.s32.totalorder %s3878_s18, 5 }
  0x1c   : > { %4758 = sst [smem:[#allocation39_spill]] %s3854_s29  ;;  %s3880_s22 = smov [#allocation8]  }
  0x1d   : > { %4759 = sst [smem:[#allocation40_spill]] %s3858_s30  ;;  %p4051_p3 = pnand %p2691_p0, %p358_p2 }
  0x1e   : > { %4760 = sst [smem:[#allocation41_spill]] %s3862_s14  ;;  %s370_s23 = sshll.u32 %s3880_s22, 4  ;;  %s4055_s23 = int_to_ptr.vmem [resolvable:$true] %s370_s23 }
  0x1f   : > { %4761 = sst [smem:[#allocation42_spill]] %s3866_s15  ;;  %p3116_p4 = pneg %p4051_p3 }
  0x20   : > { %s4762_s20 = scalar_select %p4046_p1, 1, 0 }
  0x21   : > { %s4764_s21 = scalar_select %p4051_p3, 1, 0 }
  0x22   : > { %4763 = sst [smem:[#allocation43_spill]] %s4762_s20  ;;  %p4061_p5 = pnand %p3116_p4, %p4046_p1 }
  0x23   : > { %4765 = sst [smem:[#allocation44_spill]] %s4764_s21  ;;  %s3881_s19 = smov [#allocation11]  }
  0x24   : > { %s396_s13 = sshll.u32 %s3881_s19, 4  ;;  %s3882_s15 = smov [#allocation14]   ;;  %s4065_s13 = int_to_ptr.vmem [resolvable:$true] %s396_s13 }
  0x25   : > { %s4067_s14 = sshll.u32 %s3882_s15, 4  ;;  %s4767_s1 = sld [smem:[#allocation46_spill]]  ;;  %s421_s14 = int_to_ptr.vmem [resolvable:$true] %s4067_s14 }
  0x26   : > { %p4077_p7 = pneg %p4061_p5 }
  0x2b   : > { %s3366_s22 = scalar_lea.hbm %s4767_s1, 2048 }
  0x2c   : > { %p3367_p6 = scmp.ne.s32.totalorder %s4767_s1, %s3366_s22  ;;  %p3373_p10 = scmp.lt.u32.totalorder %s3366_s22, %s4767_s1 }
  0x2e   : > { %p3369_p8 = pnand %p4077_p7, %p3367_p6 }
  0x30   : > { %p3370_p9 = pneg %p3369_p8 }
  0x32   : > { %p3375_p11 = pnand %p3373_p10, %p3370_p9 }
  0x34   : > { %3378 = shalt.err (!%p3375_p11)
}
  0x35   : > { %s3379_s0 = scalar_lea.vmem %s4055_s23, 2048  ;;  %p3387_p2 = scmp.lt.s32.totalorder %s4055_s23, %s4055_s23 }
  0x36   : > { %p3380_p12 = scmp.ne.s32.totalorder %s4055_s23, %s3379_s0  ;;  %p3388_p4 = scmp.lt.s32.totalorder %s3379_s0, %s3379_s0 }
  0x38   : > { %p3382_p13 = pnand %p3380_p12, %p4077_p7  ;;  %p3389_p6 = por %p3388_p4, %p3387_p2 }
  0x3a   : > { %p3383_p0 = pneg %p3382_p13 }
  0x3c   : > { %p3390_p8 = pnand %p3389_p6, %p3383_p0 }
  0x3e   : > { %3393 = shalt.err (!%p3390_p8)
}
  0x3f   : > { %s4743_s25 = smov 64   ;;  %s4744_s26 = smov 4  }
  0x40   : > { %3119 = dma.hbm_to_vmem [thread:$0]  (!%p4061_p5), %s4767_s1, 2048, %s4055_s23, [#allocation9], %s4743_s25, %s4743_s25, %s4744_s26  }
  0x41   : > { %s4769_s3 = sld [smem:[#allocation48_spill]] }
  0x47   : > { %s3394_s0 = scalar_lea.hbm %s4769_s3, 256 }
  0x48   : > { %p3395_p9 = scmp.ne.s32.totalorder %s4769_s3, %s3394_s0  ;;  %p3401_p12 = scmp.lt.u32.totalorder %s3394_s0, %s4769_s3 }
  0x4a   : > { %p3397_p10 = pnand %p3395_p9, %p4077_p7 }
  0x4c   : > { %p3398_p11 = pneg %p3397_p10 }
  0x4e   : > { %p3403_p13 = pnand %p3401_p12, %p3398_p11 }
  0x50   : > { %3406 = shalt.err (!%p3403_p13)
}
  0x51   : > { %s3407_s23 = scalar_lea.vmem %s4065_s13, 256  ;;  %p3415_p6 = scmp.lt.s32.totalorder %s4065_s13, %s4065_s13 }
  0x52   : > { %p3408_p0 = scmp.ne.s32.totalorder %s4065_s13, %s3407_s23  ;;  %p3416_p8 = scmp.lt.s32.totalorder %s3407_s23, %s3407_s23 }
  0x54   : > { %p3410_p2 = pnand %p3408_p0, %p4077_p7  ;;  %p3417_p9 = por %p3416_p8, %p3415_p6 }
  0x56   : > { %p3411_p4 = pneg %p3410_p2 }
  0x58   : > { %p3418_p10 = pnand %p3417_p9, %p3411_p4 }
  0x5a   : > { %3421 = shalt.err (!%p3418_p10)
}
  0x5b   : > { %3125 = dma.hbm_to_vmem [thread:$0]  (!%p4061_p5), %s4769_s3, 256, %s4065_s13, [#allocation12], %s4743_s25, %s4743_s25, %s4744_s26  }
  0x5c   : > { %s4770_s5 = sld [smem:[#allocation50_spill]] }
  0x62   : > { %s3422_s21 = scalar_lea.hbm %s4770_s5, 256 }
  0x63   : > { %p3423_p11 = scmp.ne.s32.totalorder %s4770_s5, %s3422_s21  ;;  %p3429_p0 = scmp.lt.u32.totalorder %s3422_s21, %s4770_s5 }
  0x65   : > { %p3425_p12 = pnand %p3423_p11, %p4077_p7 }
  0x67   : > { %p3426_p13 = pneg %p3425_p12 }
  0x69   : > { %p3431_p2 = pnand %p3429_p0, %p3426_p13 }
  0x6b   : > { %3434 = shalt.err (!%p3431_p2)
}
  0x6c   : > { %s3435_s23 = scalar_lea.vmem %s421_s14, 256  ;;  %p3443_p9 = scmp.lt.s32.totalorder %s421_s14, %s421_s14 }
  0x6d   : > { %p3436_p4 = scmp.ne.s32.totalorder %s421_s14, %s3435_s23  ;;  %p3444_p10 = scmp.lt.s32.totalorder %s3435_s23, %s3435_s23 }
  0x6f   : > { %p3438_p6 = pnand %p3436_p4, %p4077_p7  ;;  %p3445_p3 = por %p3444_p10, %p3443_p9 }
  0x71   : > { %p3439_p8 = pneg %p3438_p6 }
  0x73   : > { %p3446_p1 = pnand %p3445_p3, %p3439_p8 }
  0x75   : > { %3449 = shalt.err (!%p3446_p1)
}
  0x76   : > { %3131 = dma.hbm_to_vmem [thread:$0]  (!%p4061_p5), %s4770_s5, 256, %s421_s14, [#allocation15], %s4743_s25, %s4743_s25, %s4744_s26  }
  0x77   : > { %s3885_s29 = smov [#allocation17]   ;;  %s3886_s20 = smov [#allocation20]  }
  0x78   : > { %s445_s30 = sshll.u32 %s3885_s29, 4  ;;  %s467_s21 = sshll.u32 %s3886_s20, 4  ;;  %s446_s30 = int_to_ptr.vmem [resolvable:$true] %s445_s30  ;;  %s468_s21 = int_to_ptr.vmem [resolvable:$true] %s467_s21 }
  0x79   : > { %s3450_s15 = scalar_lea.hbm %s4721_s7, 64 }
  0x7a   : > { %p3451_p1 = scmp.ne.s32.totalorder %s4721_s7, %s3450_s15  ;;  %p3457_p12 = scmp.lt.u32.totalorder %s3450_s15, %s4721_s7 }
  0x7c   : > { %p3453_p3 = pnand %p3451_p1, %p4077_p7 }
  0x7e   : > { %p3454_p11 = pneg %p3453_p3 }
  0x80   : > { %p3459_p13 = pnand %p3457_p12, %p3454_p11 }
  0x82   : > { %3462 = shalt.err (!%p3459_p13)
}
  0x83   : > { %s3463_s14 = scalar_lea.vmem %s446_s30, 64  ;;  %p3471_p6 = scmp.lt.s32.totalorder %s446_s30, %s446_s30 }
  0x84   : > { %p3464_p0 = scmp.ne.s32.totalorder %s446_s30, %s3463_s14  ;;  %p3472_p8 = scmp.lt.s32.totalorder %s3463_s14, %s3463_s14 }
  0x86   : > { %p3466_p2 = pnand %p3464_p0, %p4077_p7  ;;  %p3473_p9 = por %p3472_p8, %p3471_p6 }
  0x88   : > { %p3467_p4 = pneg %p3466_p2 }
  0x8a   : > { %p3474_p10 = pnand %p3473_p9, %p3467_p4 }
  0x8c   : > { %3477 = shalt.err (!%p3474_p10)
}
  0x8d   : > { %3137 = dma.hbm_to_vmem [thread:$0]  (!%p4061_p5), %s4721_s7, 64, %s446_s30, [#allocation18]  }
  0x8e   : > { %s3478_s22 = scalar_lea.hbm %s4723_s9, 64 }
  0x8f   : > { %p3479_p1 = scmp.ne.s32.totalorder %s4723_s9, %s3478_s22  ;;  %p3485_p12 = scmp.lt.u32.totalorder %s3478_s22, %s4723_s9 }
  0x91   : > { %p3481_p3 = pnand %p3479_p1, %p4077_p7 }
  0x93   : > { %p3482_p11 = pneg %p3481_p3 }
  0x95   : > { %p3487_p13 = pnand %p3485_p12, %p3482_p11 }
  0x97   : > { %3490 = shalt.err (!%p3487_p13)
}
  0x98   : > { %s3491_s13 = scalar_lea.vmem %s468_s21, 64  ;;  %p3499_p6 = scmp.lt.s32.totalorder %s468_s21, %s468_s21 }
  0x99   : > { %p3492_p0 = scmp.ne.s32.totalorder %s468_s21, %s3491_s13  ;;  %p3500_p8 = scmp.lt.s32.totalorder %s3491_s13, %s3491_s13 }
  0x9b   : > { %p3494_p2 = pnand %p3492_p0, %p4077_p7  ;;  %p3501_p9 = por %p3500_p8, %p3499_p6 }
  0x9d   : > { %p3495_p4 = pneg %p3494_p2 }
  0x9f   : > { %p3502_p10 = pnand %p3501_p9, %p3495_p4 }
  0xa1   : > { %3505 = shalt.err (!%p3502_p10)
}
  0xa2   : > { %3143 = dma.hbm_to_vmem [thread:$0]  (!%p4061_p5), %s4723_s9, 64, %s468_s21, [#allocation21]  }
  0xa3   : > { %s3887_s28 = smov [#allocation23]   ;;  %s3888_s1 = smov [#allocation10]  }
  0xa4   : > { %s488_s29 = sshll.u32 %s3887_s28, 4  ;;  %s383_s20 = sshll.u32 %s3888_s1, 4  ;;  %s489_s29 = int_to_ptr.vmem [resolvable:$true] %s488_s29  ;;  %s384_s20 = int_to_ptr.vmem [resolvable:$true] %s383_s20 }
  0xa5   : > { %s3506_s15 = scalar_lea.hbm %s4725_s11, 256 }
  0xa6   : > { %p3507_p1 = scmp.ne.s32.totalorder %s4725_s11, %s3506_s15  ;;  %p3513_p12 = scmp.lt.u32.totalorder %s3506_s15, %s4725_s11 }
  0xa8   : > { %p3509_p3 = pnand %p3507_p1, %p4077_p7 }
  0xaa   : > { %p3510_p11 = pneg %p3509_p3 }
  0xac   : > { %p3515_p13 = pnand %p3513_p12, %p3510_p11 }
  0xae   : > { %3518 = shalt.err (!%p3515_p13)
}
  0xaf   : > { %s3519_s21 = scalar_lea.vmem %s489_s29, 256  ;;  %p3527_p6 = scmp.lt.s32.totalorder %s489_s29, %s489_s29 }
  0xb0   : > { %p3520_p0 = scmp.ne.s32.totalorder %s489_s29, %s3519_s21  ;;  %p3528_p8 = scmp.lt.s32.totalorder %s3519_s21, %s3519_s21 }
  0xb2   : > { %p3522_p2 = pnand %p3520_p0, %p4077_p7  ;;  %p3529_p9 = por %p3528_p8, %p3527_p6 }
  0xb4   : > { %p3523_p4 = pneg %p3522_p2 }
  0xb6   : > { %p3530_p10 = pnand %p3529_p9, %p3523_p4 }
  0xb8   : > { %3533 = shalt.err (!%p3530_p10)
}
  0xb9   : > { %3149 = dma.hbm_to_vmem [thread:$0]  (!%p4061_p5), %s4725_s11, 256, %s489_s29, [#allocation24], %s4743_s25, %s4743_s25, %s4744_s26  }
  0xba   : > { %s4771_s2 = sld [smem:[#allocation47_spill]] }
  0xc0   : > { %s3534_s19 = scalar_lea.hbm %s4771_s2, 128 }
  0xc1   : > { %p3535_p1 = scmp.ne.s32.totalorder %s4771_s2, %s3534_s19  ;;  %p3541_p12 = scmp.lt.u32.totalorder %s3534_s19, %s4771_s2 }
  0xc3   : > { %p3537_p3 = pnand %p3535_p1, %p4077_p7 }
  0xc5   : > { %p3538_p11 = pneg %p3537_p3 }
  0xc7   : > { %p3543_p13 = pnand %p3541_p12, %p3538_p11 }
  0xc9   : > { %3546 = shalt.err (!%p3543_p13)
}
  0xca   : > { %s3547_s30 = scalar_lea.vmem %s384_s20, 128  ;;  %p3555_p6 = scmp.lt.s32.totalorder %s384_s20, %s384_s20 }
  0xcb   : > { %p3548_p0 = scmp.ne.s32.totalorder %s384_s20, %s3547_s30  ;;  %p3556_p8 = scmp.lt.s32.totalorder %s3547_s30, %s3547_s30 }
  0xcd   : > { %p3550_p2 = pnand %p3548_p0, %p4077_p7  ;;  %p3557_p9 = por %p3556_p8, %p3555_p6 }
  0xcf   : > { %p3551_p4 = pneg %p3550_p2 }
  0xd1   : > { %p3558_p10 = pnand %p3557_p9, %p3551_p4 }
  0xd3   : > { %3561 = shalt.err (!%p3558_p10)
}
  0xd4   : > { %s3889_s29 = smov 16   ;;  %s3890_s21 = smov 1  }
  0xd5   : > { %3122 = dma.hbm_to_vmem [thread:$0]  (!%p4061_p5), %s4771_s2, 128, %s384_s20, [#allocation9], %s3889_s29, %s3889_s29, %s3890_s21  }
  0xd6   : > { %s3891_s1 = smov [#allocation13]   ;;  %s3892_s19 = smov [#allocation16]  }
  0xd7   : > { %s410_s22 = sshll.u32 %s3891_s1, 4  ;;  %s434_s15 = sshll.u32 %s3892_s19, 4  ;;  %s411_s22 = int_to_ptr.vmem [resolvable:$true] %s410_s22  ;;  %s435_s15 = int_to_ptr.vmem [resolvable:$true] %s434_s15 }
  0xd8   : > { %s4772_s4 = sld [smem:[#allocation49_spill]] }
  0xde   : > { %s3562_s13 = scalar_lea.hbm %s4772_s4, 16 }
  0xdf   : > { %p3563_p1 = scmp.ne.s32.totalorder %s4772_s4, %s3562_s13  ;;  %p3569_p12 = scmp.lt.u32.totalorder %s3562_s13, %s4772_s4 }
  0xe1   : > { %p3565_p3 = pnand %p3563_p1, %p4077_p7 }
  0xe3   : > { %p3566_p11 = pneg %p3565_p3 }
  0xe5   : > { %p3571_p13 = pnand %p3569_p12, %p3566_p11 }
  0xe7   : > { %3574 = shalt.err (!%p3571_p13)
}
  0xe8   : > { %s3575_s20 = scalar_lea.vmem %s411_s22, 16  ;;  %s3582_s29 = scalar_lea.vmem %s411_s22, 32 }
  0xe9   : > { %p3576_p0 = scmp.ne.s32.totalorder %s411_s22, %s3575_s20  ;;  %p3583_p6 = scmp.lt.s32.totalorder %s411_s22, %s411_s22 }
  0xea   : > { %p3584_p8 = scmp.lt.s32.totalorder %s3582_s29, %s3575_s20 }
  0xeb   : > { %p3578_p2 = pnand %p3576_p0, %p4077_p7 }
  0xec   : > { %p3585_p9 = por %p3584_p8, %p3583_p6 }
  0xed   : > { %p3579_p4 = pneg %p3578_p2 }
  0xef   : > { %p3586_p10 = pnand %p3585_p9, %p3579_p4 }
  0xf1   : > { %3589 = shalt.err (!%p3586_p10)
}
  0xf2   : > { %3128 = dma.hbm_to_vmem [thread:$0]  (!%p4061_p5), %s4772_s4, 16, %s411_s22, [#allocation12]  }
  0xf3   : > { %s4773_s6 = sld [smem:[#allocation51_spill]] }
  0xf9   : > { %s3590_s14 = scalar_lea.hbm %s4773_s6, 16 }
  0xfa   : > { %p3591_p1 = scmp.ne.s32.totalorder %s4773_s6, %s3590_s14  ;;  %p3597_p12 = scmp.lt.u32.totalorder %s3590_s14, %s4773_s6 }
  0xfc   : > { %p3593_p3 = pnand %p3591_p1, %p4077_p7 }
  0xfe   : > { %p3594_p11 = pneg %p3593_p3 }
 0x100   : > { %p3599_p13 = pnand %p3597_p12, %p3594_p11 }
 0x102   : > { %3602 = shalt.err (!%p3599_p13)
}
 0x103   : > { %s3603_s23 = scalar_lea.vmem %s435_s15, 16  ;;  %s3610_s22 = scalar_lea.vmem %s435_s15, 32 }
 0x104   : > { %p3604_p0 = scmp.ne.s32.totalorder %s435_s15, %s3603_s23  ;;  %p3611_p6 = scmp.lt.s32.totalorder %s435_s15, %s435_s15 }
 0x105   : > { %p3612_p8 = scmp.lt.s32.totalorder %s3610_s22, %s3603_s23 }
 0x106   : > { %p3606_p2 = pnand %p3604_p0, %p4077_p7 }
 0x107   : > { %p3613_p9 = por %p3612_p8, %p3611_p6 }
 0x108   : > { %p3607_p4 = pneg %p3606_p2 }
 0x10a   : > { %p3614_p10 = pnand %p3613_p9, %p3607_p4 }
 0x10c   : > { %3617 = shalt.err (!%p3614_p10)
}
 0x10d   : > { %3134 = dma.hbm_to_vmem [thread:$0]  (!%p4061_p5), %s4773_s6, 16, %s435_s15, [#allocation15]  }
 0x10e   : > { %s3893_s20 = smov [#allocation19]   ;;  %s3894_s25 = smov [#allocation22]  }
 0x10f   : > { %s456_s29 = sshll.u32 %s3893_s20, 4  ;;  %s478_s21 = sshll.u32 %s3894_s25, 4  ;;  %s457_s29 = int_to_ptr.vmem [resolvable:$true] %s456_s29  ;;  %s479_s21 = int_to_ptr.vmem [resolvable:$true] %s478_s21 }
 0x110   : > { %s3618_s14 = scalar_lea.hbm %s4722_s8, 128 }
 0x111   : > { %p3619_p1 = scmp.ne.s32.totalorder %s4722_s8, %s3618_s14  ;;  %p3625_p12 = scmp.lt.u32.totalorder %s3618_s14, %s4722_s8 }
 0x113   : > { %p3621_p3 = pnand %p3619_p1, %p4077_p7 }
 0x115   : > { %p3622_p11 = pneg %p3621_p3 }
 0x117   : > { %p3627_p13 = pnand %p3625_p12, %p3622_p11 }
 0x119   : > { %3630 = shalt.err (!%p3627_p13)
}
 0x11a   : > { %s3631_s15 = scalar_lea.vmem %s457_s29, 128  ;;  %p3639_p6 = scmp.lt.s32.totalorder %s457_s29, %s457_s29 }
 0x11b   : > { %p3632_p0 = scmp.ne.s32.totalorder %s457_s29, %s3631_s15  ;;  %p3640_p8 = scmp.lt.s32.totalorder %s3631_s15, %s3631_s15 }
 0x11d   : > { %p3634_p2 = pnand %p3632_p0, %p4077_p7  ;;  %p3641_p9 = por %p3640_p8, %p3639_p6 }
 0x11f   : > { %p3635_p4 = pneg %p3634_p2 }
 0x121   : > { %p3642_p10 = pnand %p3641_p9, %p3635_p4 }
 0x123   : > { %3645 = shalt.err (!%p3642_p10)
}
 0x124   : > { %3140 = dma.hbm_to_vmem [thread:$0]  (!%p4061_p5), %s4722_s8, 128, %s457_s29, [#allocation18]  }
 0x125   : > { %s3646_s20 = scalar_lea.hbm %s4724_s10, 128 }
 0x126   : > { %p3647_p1 = scmp.ne.s32.totalorder %s4724_s10, %s3646_s20  ;;  %p3653_p12 = scmp.lt.u32.totalorder %s3646_s20, %s4724_s10 }
 0x128   : > { %p3649_p3 = pnand %p3647_p1, %p4077_p7 }
 0x12a   : > { %p3650_p11 = pneg %p3649_p3 }
 0x12c   : > { %p3655_p13 = pnand %p3653_p12, %p3650_p11 }
 0x12e   : > { %3658 = shalt.err (!%p3655_p13)
}
 0x12f   : > { %s3659_s28 = scalar_lea.vmem %s479_s21, 128  ;;  %p3667_p6 = scmp.lt.s32.totalorder %s479_s21, %s479_s21 }
 0x130   : > { %p3660_p0 = scmp.ne.s32.totalorder %s479_s21, %s3659_s28  ;;  %p3668_p8 = scmp.lt.s32.totalorder %s3659_s28, %s3659_s28 }
 0x132   : > { %p3662_p2 = pnand %p3660_p0, %p4077_p7  ;;  %p3669_p9 = por %p3668_p8, %p3667_p6 }
 0x134   : > { %p3663_p4 = pneg %p3662_p2 }
 0x136   : > { %p3670_p10 = pnand %p3669_p9, %p3663_p4 }
 0x138   : > { %3673 = shalt.err (!%p3670_p10)
}
 0x139   : > { %3146 = dma.hbm_to_vmem [thread:$0]  (!%p4061_p5), %s4724_s10, 128, %s479_s21, [#allocation21]  }
 0x13a   : > { %s3895_s19 = smov [#allocation25]   ;;  %s3674_s22 = scalar_lea.hbm %s4726_s12, 16 }
 0x13b   : > { %s502_s0 = sshll.u32 %s3895_s19, 4  ;;  %p3675_p1 = scmp.ne.s32.totalorder %s4726_s12, %s3674_s22  ;;  %s503_s0 = int_to_ptr.vmem [resolvable:$true] %s502_s0 }
 0x13c   : > { %p3681_p12 = scmp.lt.u32.totalorder %s3674_s22, %s4726_s12 }
 0x13d   : > { %p3677_p3 = pnand %p3675_p1, %p4077_p7 }
 0x13f   : > { %p3678_p11 = pneg %p3677_p3 }
 0x141   : > { %p3683_p13 = pnand %p3681_p12, %p3678_p11 }
 0x143   : > { %3686 = shalt.err (!%p3683_p13)
}
 0x144   : > { %s3687_s21 = scalar_lea.vmem %s503_s0, 16  ;;  %s3694_s3 = scalar_lea.vmem %s503_s0, 32 }
 0x145   : > { %p3688_p0 = scmp.ne.s32.totalorder %s503_s0, %s3687_s21  ;;  %p3695_p6 = scmp.lt.s32.totalorder %s503_s0, %s503_s0 }
 0x146   : > { %p3696_p8 = scmp.lt.s32.totalorder %s3694_s3, %s3687_s21 }
 0x147   : > { %p3690_p2 = pnand %p3688_p0, %p4077_p7 }
 0x148   : > { %p3697_p9 = por %p3696_p8, %p3695_p6 }
 0x149   : > { %p3691_p4 = pneg %p3690_p2 }
 0x14b   : > { %p3698_p10 = pnand %p3697_p9, %p3691_p4 }
 0x14d   : > { %3701 = shalt.err (!%p3698_p10)
}
 0x14e   : > { %s4774_s28 = sld [smem:[#allocation40_spill]]  ;;  %s4775_s29 = sld [smem:[#allocation39_spill]] }
 0x14f   : > { %s4776_s27 = sld [smem:[#allocation38_spill]]  ;;  %s4777_s1 = sld [smem:[#allocation43_spill]] }
 0x150   : > { %3152 = dma.hbm_to_vmem [thread:$0]  (!%p4061_p5), %s4726_s12, 16, %s503_s0, [#allocation24]  }
 0x151   : > { %s4778_s19 = sld [smem:[#allocation37_spill]]  ;;  %s2690_s15 = sadd.s32 4294967294, %s3878_s18  }
 0x152   : > { %s4779_s23 = sld [smem:[#allocation36_spill]]  ;;  %s44_s24 = sadd.s32 1, %s3870_s16 }
 0x153   : > { %p45_p7 = scmp.ge.s32.totalorder %s44_s24, 2  ;;  %s47_s22 = sadd.s32 1, %s3874_s17 }
 0x154   : > { %s54_s13 = sadd.s32 1, %s4774_s28  ;;  %p61_p1 = scmp.ne.s32.totalorder %s4774_s28, %s4775_s29 }
 0x155   : > { %s4818_s24 = smov (%p45_p7, %s44_s24), 0  ;;  %s4820_s22 = smov (!%p45_p7, %s47_s22), %s3874_s17 }
 0x156   : > { %p62_p3 = scmp.eq.s32.totalorder %s3878_s18, 0  ;;  %p67_p11 = scmp.ne.s32.totalorder %s4775_s29, %s4776_s27 }
 0x157   : > { %s4780_s0 = sld [smem:[#allocation35_spill]]  ;;  %p49_p5 = scmp.ge.s32.totalorder %s4820_s22, 2 }
 0x158   : > { %s330_s30 = ssub.s32 %s3870_s16, %s4818_s24  ;;  %p4328_p12 = por %p62_p3, %p61_p1 }
 0x159   : > { %p4782_p13 = scmp.ne.s32.totalorder %s4777_s1, 0  ;;  %s4822_s22 = smov (%p49_p5, %s4820_s22), 0 }
 0x15a   : > { %s334_s21 = sadd.s32 1, %s4778_s19  ;;  %p344_p2 = scmp.ne.s32.totalorder %s4778_s19, %s4779_s23 }
 0x15b   : > { %p4334_p0 = por %p4782_p13, %p67_p11  ;;  %s51_s3 = ssub.s32 %s3874_s17, %s4822_s22 }
 0x15c   : > { %s4784_s26 = sadd.s32 4294967295, %s3878_s18   ;;  %p52_p6 = scmp.eq.s32.totalorder %s51_s3, 0 }
 0x15d   : > { %p345_p4 = scmp.eq.s32.totalorder %s4784_s26, 3  ;;  %s331_s14 = sor.u32 %s330_s30, %s51_s3 }
 0x15e   : > { %p332_p8 = scmp.eq.s32.totalorder %s331_s14, 0  ;;  %p350_p10 = scmp.ne.s32.totalorder %s4779_s23, %s4780_s0 }
 0x15f   : > { %p4347_p9 = por %p345_p4, %p344_p2  ;;  %p351_p7 = scmp.eq.s32.totalorder %s2690_s15, 3 }
 0x160   : > { %s4352_s27 = scalar_select %p52_p6, %s4774_s28, %s54_s13  }
 0x161   : > { %s4785_s29 = scalar_select %p4347_p9, 1, 0 }
 0x162   : > { %s4824_s19 = smov (!%p332_p8, %s4778_s19), %s334_s21  ;;  %p3173_p1 = scmp.lt.s32.totalorder %s3878_s18, 4 }
 0x163   : > { %s513_s1 = sand.u32 1, %s4774_s28   ;;  %p4361_p3 = por %p351_p7, %p350_p10 }
 0x164   : > { %s2705_s26 = sshll.u32 %s513_s1, 3  ;;  %s2796_s4 = sshll.u32 %s3874_s17, 7 }
 0x165   : > { %s4786_s2 = scalar_select %p4361_p3, 1, 0 }
 0x166   : > { %s4787_s14 = sld [smem:[#allocation45_spill]]  ;;  %s517_s13 = scalar_lea.vmem [#allocation5], %s2705_s26 }
 0x167   : > { %s524_s23 = sshll.u32 %s517_s13, 4  ;;  %p4373_p11 = pnand %p3173_p1, %p4328_p12  ;;  %s4377_s23 = int_to_ptr.vmem [resolvable:$true] %s524_s23 }
 0x168   : > { %s4379_s15 = scalar_lea.sflag [#allocation6], %s513_s1 }
 0x169   : > { %p3704_p13 = pneg %p4373_p11 }
 0x16c   : > { %s4788_s5 = smov %s4787_s14  ;;  %s4369_s6 = scalar_lea.hbm %s4787_s14, %s2796_s4 }
 0x16d   : > { %s3702_s0 = scalar_lea.hbm %s4369_s6, 128  ;;  %s3707_s21 = scalar_lea.hbm %s4788_s5, 256 }
 0x16e   : > { %p3703_p5 = scmp.ne.s32.totalorder %s4369_s6, %s3702_s0  ;;  %p3708_p12 = scmp.lt.u32.totalorder %s4369_s6, %s4788_s5 }
 0x16f   : > { %p3709_p6 = scmp.lt.u32.totalorder %s3707_s21, %s3702_s0  ;;  %p3711_p10 = scmp.lt.u32.totalorder %s3702_s0, %s4369_s6 }
 0x170   : > { %p3705_p2 = pnand %p3704_p13, %p3703_p5 }
 0x171   : > { %p3710_p8 = por %p3709_p6, %p3708_p12 }
 0x172   : > { %p3706_p4 = pneg %p3705_p2 }
 0x173   : > { %p3712_p7 = por %p3711_p10, %p3710_p8 }
 0x175   : > { %p3713_p1 = pnand %p3712_p7, %p3706_p4 }
 0x177   : > { %3716 = shalt.err (!%p3713_p1)
}
 0x178   : > { %s3717_s1 = scalar_lea.vmem %s4377_s23, 128  ;;  %s3896_s3 = smov [#allocation5]  }
 0x179   : > { %p3718_p5 = scmp.ne.s32.totalorder %s4377_s23, %s3717_s1  ;;  %s3722_s14 = sshll.u32 %s3896_s3, 4  ;;  %s3723_s14 = int_to_ptr.vmem [resolvable:$false] %s3722_s14 }
 0x17a   : > { %s3724_s13 = scalar_lea.vmem %s3723_s14, 256  ;;  %p3725_p9 = scmp.lt.s32.totalorder %s4377_s23, %s3723_s14 }
 0x17b   : > { %p3720_p2 = pnand %p3718_p5, %p3704_p13  ;;  %p3726_p12 = scmp.lt.s32.totalorder %s3724_s13, %s3717_s1 }
 0x17d   : > { %p3721_p3 = pneg %p3720_p2  ;;  %p3727_p6 = por %p3726_p12, %p3725_p9 }
 0x17f   : > { %p3728_p8 = pnand %p3727_p6, %p3721_p3 }
 0x181   : > { %3731 = shalt.err (!%p3728_p8)
}
 0x182   : > { %s4790_s0 = smov 4   ;;  %s4791_s4 = smov 64  }
 0x183   : > { %3156 = dma.hbm_to_vmem [thread:$0]  (!%p4373_p11), %s4369_s6, 128, %s4377_s23, %s4379_s15, %s4791_s4, %s4791_s4, %s4790_s0  }
 0x184   : > { %s4792_s20 = sld [smem:[#allocation44_spill]] }
 0x18a   : > { %p4793_p13 = scmp.ne.s32.totalorder %s4792_s20, 0 }
 0x18b   : > { %s4794_s21 = sld [smem:[#allocation39_spill]] (!%p4793_p13) }
 0x18c   : > { %536 = sbr.rel (%p4793_p13) target bundleno = 6093 (0x17cd), region = 72 }
 0x191   : > { %s538_s26 = sand.u32 (!%p4793_p13), 1, %s4794_s21  }
 0x192   : > { %s4413_s30 = sshll.u32 (!%p4793_p13), %s538_s26, 3  ;;  %s539_s1 = scalar_lea.sflag (!%p4793_p13), [#allocation6], %s538_s26 }
 0x193   : > { %s542_s3 = scalar_lea.vmem [#allocation5], %s4413_s30 }
 0x194   : > { %3805 = dma.done.wait (%p4334_p0), %s539_s1, 128  }
 0x195   : > { %3807 = vsyncadd (%p4334_p0), %s539_s1, 4294967168  ;;  %s4795_s28 = sld [smem:[#allocation43_spill]] }
 0x19b   : > { %p4796_p9 = scmp.ne.s32.totalorder %s4795_s28, 0 }
 0x19d   : > { %3809 = dma.done.wait (%p4796_p9), [#allocation9], 2176  }
 0x19e   : > { %3811 = vsyncadd (%p4796_p9), [#allocation9], 4294965120 }
 0x19f   : > { %3813 = dma.done.wait (%p4796_p9), [#allocation12], 272  }
 0x1a0   : > { %3815 = vsyncadd (%p4796_p9), [#allocation12], 4294967024 }
 0x1a1   : > { %3817 = dma.done.wait (%p4796_p9), [#allocation15], 272  }
 0x1a2   : > { %3819 = vsyncadd (%p4796_p9), [#allocation15], 4294967024 }
 0x1a3   : > { %3821 = dma.done.wait (%p4796_p9), [#allocation18], 192  }
 0x1a4   : > { %3823 = vsyncadd (%p4796_p9), [#allocation18], 4294967104 }
 0x1a5   : > { %3825 = dma.done.wait (%p4796_p9), [#allocation21], 192  }
 0x1a6   : > { %3827 = vsyncadd (%p4796_p9), [#allocation21], 4294967104 }
 0x1a7   : > { %3829 = dma.done.wait (%p4796_p9), [#allocation24], 272  }
 0x1a8   : > { %3831 = vsyncadd (%p4796_p9), [#allocation24], 4294967024  ;;  %s4797_s6 = sld [smem:[#allocation36_spill]]  ;;  %s4798_s14 = sld [smem:[#allocation41_spill]] }
 0x1ae   : > { %s630_s25 = sand.u32 1, %s4797_s6   ;;  %p2723_p0 = scmp.ne.s32.totalorder %s4798_s14, 0 }
 0x1af   : > { %s4447_s23 = sshll.u32 %s630_s25, 3  ;;  %v3311_v0 = vld [vmem:[#allocation11] sm:$0xff] (!%p2723_p0)   ;;  %v3897_v1 = vmov (!%p2723_p0), 0.0   ;;  %v3312_v2 = vld [vmem:[#allocation14] sm:$0xff] (!%p2723_p0)   ;;  %v3313_v3 = vld [vmem:[#allocation11 + $0x8] sm:$0xff] (!%p2723_p0)   ;;  %vm3898_vm0 = vmmov (!%p2723_p0), 0  }
 0x1b0   : > { %s632_s15 = scalar_lea.vmem [#allocation26], %s4447_s23  ;;  %637 = sbr.rel (%p2723_p0) target bundleno = 1021 (0x3fd), region = 128  ;;  %2868 = vmatprep.subr.bf16.mxu0 (!%p2723_p0), %v3897_v1  ;;  %2876 = vmatprep.subr.bf16.mxu1 (!%p2723_p0), %v3897_v1  ;;  %v3314_v4 = vld [vmem:[#allocation14 + $0x8] sm:$0xff] (!%p2723_p0)   ;;  %v3315_v5 = vld [vmem:[%s542_s3] sm:$0xff] (!%p2723_p0)   ;;  %vm668_vm1 = vcmask (!%p2723_p0), 261120   ;;  %v3899_v7 = vmov (!%p2723_p0), 0  }
 0x1b1   : > { %2869 = vmatpush3.bf16.msra.mxu0 (!%p2723_p0), %v3311_v0  ;;  %2872 = vmatprep.mubr.msk.bf16.mxu0 (!%p2723_p0), %vm3898_vm0, %v3897_v1  ;;  %v779_v6 = vld [vmem:[#allocation19] sm:$0xff] (!%p2723_p0)  ;;  %v831_v8 = vld [vmem:[#allocation22] sm:$0xff] (!%p2723_p0)  ;;  %v2729_v9 = vld [vmem:[#allocation16] ss:$0 sm:$0xff] (!%p2723_p0)  ;;  %vm785_vm2 = vcmask (!%p2723_p0), 130048   ;;  %vm882_vm3 = vcmask (!%p2723_p0), 27648  }
 0x1b2   : > { %2877 = vmatpush3.bf16.msra.mxu1 (!%p2723_p0), %v3312_v2  ;;  %2870 = vmatprep.subr.bf16.mxu0 (!%p2723_p0), %v3897_v1  ;;  %v2724_v10 = vld [vmem:[#allocation13] ss:$0 sm:$0xff] (!%p2723_p0)  ;;  %v777_v25 = vld [vmem:[#allocation17] sm:$0xf] (!%p2723_p0)  ;;  %s3900_s13 = smov (!%p2723_p0), 120   ;;  %s3901_s0 = smov (!%p2723_p0), 124  }
 0x1b3   : > { %2878 = vmatprep.subr.bf16.mxu1 (!%p2723_p0), %v3897_v1  ;;  %2880 = vmatprep.mubr.msk.bf16.mxu1 (!%p2723_p0), %vm3898_vm0, %v3897_v1  ;;  %v829_v26 = vld [vmem:[#allocation20] sm:$0xf] (!%p2723_p0)  ;;  %s3902_s4 = smov (!%p2723_p0), 116   ;;  %s3903_s20 = smov (!%p2723_p0), 112  }
 0x1b4   : > { %3310 = vset.pattern.permute.xlu0 (!%p2723_p0), %v3899_v7  ;;  %s3904_s21 = smov (!%p2723_p0), 108   ;;  %s3905_s26 = smov (!%p2723_p0), 104  }
 0x1b5   : > { %2871 = vmatpush3.bf16.msra.mxu0 (!%p2723_p0), %v3313_v3  ;;  %782 = vperm.xlu0 (!%p2723_p0), %3310, %v779_v6   ;;  %s3906_s1 = smov (!%p2723_p0), 100  }
 0x1b6   : > { %2879 = vmatpush3.bf16.msra.mxu1 (!%p2723_p0), %v3314_v4  ;;  %2884 = vmatprep.subr.bf16.mxu0 (!%p2723_p0), %v3897_v1 }
 0x1b7   : > { %2890 = vmatprep.subr.bf16.mxu1 %v3897_v1 }
 0x1b8   : > { %2873 = vmatmul.mubr.msk.bf16.vlgmr.msra.gmra.mrb[0].mxu0 %vm668_vm1, %v3315_v5 }
 0x1b9   : > { %2881 = vmatmul.mubr.msk.bf16.vlgmr.msra.gmra.mrb[0].mxu1 %vm668_vm1, %v3315_v5  ;;  %2886 = vmatprep.mubr.msk.bf16.mxu0 %vm3898_vm0, %v3897_v1 }
 0x1ba   : > { %2892 = vmatprep.mubr.msk.bf16.mxu1 %vm3898_vm0, %v3897_v1  ;;  %834 = vperm.xlu0 %3310, %v831_v8  }
 0x234   : > { %v783_v27 = vpop.permute.xlu0 %782 }
 0x239   : > { %v835_v28 = vpop.permute.xlu0 %834 }
 0x28b   : > { %v706_v11 = vpop.f32.mrb[0].mxu0 }
 0x28c   : > { %v2874_v12 = vpop.f32.mrb[1].mxu0  ;;  %v770_v13 = vpop.f32.mrb[0].mxu1  ;;  %v707_v17 = vadd.f32 %v2724_v10, %v706_v11 }
 0x28d   : > { %v771_v14 = vadd.f32 %v2729_v9, %v770_v13  ;;  %v709_v15 = vpop.f32.mrb[2].mxu0  ;;  %v2882_v16 = vpop.f32.mrb[1].mxu1 }
 0x28e   : > { %v710_v18 = vadd.f32 %v2724_v10, %v709_v15  ;;  %v2875_v19 = vpop.f32.mrb[3].mxu0  ;;  %v773_v20 = vpop.f32.mrb[2].mxu1 }
 0x28f   : > { %v774_v21 = vadd.f32 %v2729_v9, %v773_v20  ;;  %v2883_v22 = vpop.f32.mrb[3].mxu1 }
 0x290   : > { %v778_v23 = vpack.c.bf16 %v710_v18, %v707_v17 }
 0x291   : > { %v830_v24 = vpack.c.bf16 %v774_v21, %v771_v14 }
 0x292   : > { %2885 = vmatpush3.bf16.msra.mxu0 %v778_v23 }
 0x293   : > { %2891 = vmatpush3.bf16.msra.mxu1 %v830_v24 }
 0x295   : > { %2887 = vmatmul.mubr.msk.bf16.vlgmr.msra.gmra.mrb[4].mxu0 %vm785_vm2, %v777_v25 }
 0x296   : > { %2893 = vmatmul.mubr.msk.bf16.vlgmr.msra.gmra.mrb[4].mxu1 %vm785_vm2, %v829_v26 }
 0x368   : > { %v823_v29 = vpop.f32.mrb[4].mxu0 }
 0x369   : > { %v824_v30 = vadd.f32 %v823_v29, %v783_v27  ;;  %v2888_v31 = vpop.f32.mrb[5].mxu0  ;;  %v874_v32 = vpop.f32.mrb[4].mxu1 }
 0x36a   : > { %v826_v33 = vpop.f32.mrb[6].mxu0  ;;  %v875_v34 = vadd.f32 %v874_v32, %v835_v28  ;;  %v2894_v35 = vpop.f32.mrb[5].mxu1 }
 0x36b   : > { %v880_v36 = vpack.c.bf16 %v824_v30, %v824_v30  ;;  %v2889_v37 = vpop.f32.mrb[7].mxu0  ;;  %v877_v38 = vpop.f32.mrb[6].mxu1 }
 0x36c   : > { %v881_v39 = vpack.c.bf16 %v875_v34, %v875_v34  ;;  %v2895_v40 = vpop.f32.mrb[7].mxu1 }
 0x36d   : > { %883 = vst.msk [vmem:[#allocation2] sm:$0xf] %vm882_vm3, %v880_v36  ;;  %901 = vrot.lane.b32.xlu0 %v880_v36, %s3900_s13  ;;  %888 = vrot.lane.b32.xlu1 %v880_v36, %s3901_s0 }
 0x36e   : > { %884 = vst.msk [vmem:[#allocation3] sm:$0xf] %vm882_vm3, %v881_v39 }
 0x371   : > { %911 = vrot.lane.b32.xlu0 %v880_v36, %s3902_s4  ;;  %896 = vrot.lane.b32.xlu1 %v881_v39, %s3901_s0 }
 0x375   : > { %921 = vrot.lane.b32.xlu0 %v880_v36, %s3903_s20  ;;  %906 = vrot.lane.b32.xlu1 %v881_v39, %s3900_s13 }
 0x379   : > { %931 = vrot.lane.b32.xlu0 %v880_v36, %s3904_s21  ;;  %916 = vrot.lane.b32.xlu1 %v881_v39, %s3902_s4 }
 0x37d   : > { %941 = vrot.lane.b32.xlu0 %v880_v36, %s3905_s26  ;;  %926 = vrot.lane.b32.xlu1 %v881_v39, %s3903_s20 }
 0x381   : > { %951 = vrot.lane.b32.xlu0 %v880_v36, %s3906_s1  ;;  %936 = vrot.lane.b32.xlu1 %v881_v39, %s3904_s21 }
 0x385   : > { %946 = vrot.lane.b32.xlu1 %v881_v39, %s3905_s26 }
 0x389   : > { %956 = vrot.lane.b32.xlu1 %v881_v39, %s3906_s1 }
 0x3df   : > { %v902_v41 = vpop.permute.xlu0 %901  ;;  %v889_v42 = vpop.permute.xlu1 %888 }
 0x3e0   : > { %905 = vst.msk [vmem:[#allocation2 + $0x8] sm:$0xf] %vm882_vm3, %v902_v41  ;;  %892 = vst.msk [vmem:[#allocation2 + $0x4] sm:$0xf] %vm882_vm3, %v889_v42 }
 0x3e3   : > { %v912_v43 = vpop.permute.xlu0 %911  ;;  %v897_v44 = vpop.permute.xlu1 %896 }
 0x3e4   : > { %915 = vst.msk [vmem:[#allocation2 + $0xc] sm:$0xf] %vm882_vm3, %v912_v43  ;;  %900 = vst.msk [vmem:[#allocation3 + $0x4] sm:$0xf] %vm882_vm3, %v897_v44 }
 0x3e7   : > { %v922_v45 = vpop.permute.xlu0 %921  ;;  %v907_v46 = vpop.permute.xlu1 %906 }
 0x3e8   : > { %925 = vst.msk [vmem:[#allocation2 + $0x10] sm:$0xf] %vm882_vm3, %v922_v45  ;;  %910 = vst.msk [vmem:[#allocation3 + $0x8] sm:$0xf] %vm882_vm3, %v907_v46 }
 0x3eb   : > { %v932_v47 = vpop.permute.xlu0 %931  ;;  %v917_v48 = vpop.permute.xlu1 %916 }
 0x3ec   : > { %935 = vst.msk [vmem:[#allocation2 + $0x14] sm:$0xf] %vm882_vm3, %v932_v47  ;;  %920 = vst.msk [vmem:[#allocation3 + $0xc] sm:$0xf] %vm882_vm3, %v917_v48 }
 0x3ef   : > { %v942_v49 = vpop.permute.xlu0 %941  ;;  %v927_v50 = vpop.permute.xlu1 %926 }
 0x3f0   : > { %945 = vst.msk [vmem:[#allocation2 + $0x18] sm:$0xf] %vm882_vm3, %v942_v49  ;;  %930 = vst.msk [vmem:[#allocation3 + $0x10] sm:$0xf] %vm882_vm3, %v927_v50 }
 0x3f3   : > { %v952_v51 = vpop.permute.xlu0 %951  ;;  %v937_v52 = vpop.permute.xlu1 %936 }
 0x3f4   : > { %955 = vst.msk [vmem:[#allocation2 + $0x1c] sm:$0xf] %vm882_vm3, %v952_v51  ;;  %940 = vst.msk [vmem:[#allocation3 + $0x14] sm:$0xf] %vm882_vm3, %v937_v52 }
 0x3f7   : > { %v947_v53 = vpop.permute.xlu1 %946 }
 0x3f8   : > { %950 = vst.msk [vmem:[#allocation3 + $0x18] sm:$0xf] %vm882_vm3, %v947_v53 }
 0x3fb   : > { %v957_v54 = vpop.permute.xlu1 %956 }
 0x3fc   : > { %960 = vst.msk [vmem:[#allocation3 + $0x1c] sm:$0xf] %vm882_vm3, %v957_v54 }
 0x3fd PF: > { %v3316_v55 = vld [vmem:[#allocation8] sm:$0xff]   ;;  %s4799_s28 = sld [smem:[#allocation41_spill]]  ;;  %v3907_v56 = vmov 0.0   ;;  %v3317_v57 = vld [vmem:[#allocation8 + $0x8] sm:$0xff]   ;;  %vm3908_vm4 = vmmov 0   ;;  %vm1036_vm5 = vcmask 31744  }
 0x3fe   : > { %2896 = vmatprep.subr.bf16.mxu0 %v3907_v56  ;;  %2904 = vmatprep.subr.bf16.mxu1 %v3907_v56  ;;  %v1035_v58 = vld [vmem:[#allocation2] sm:$0xf]  ;;  %vm990_vm6 = vcmask 261120   ;;  %v2739_v61 = vld [vmem:[#allocation10] ss:$0 sm:$0xff]  ;;  %v3318_v4 = vld [vmem:[#allocation8 + $0x10] sm:$0xff]  }
 0x3ff   : > { %2897 = vmatpush3.bf16.msra.mxu0 %v3316_v55  ;;  %2900 = vmatprep.mubr.msk.bf16.mxu0 %vm3908_vm4, %v3907_v56  ;;  %v1041_v59 = vsel %vm1036_vm5, %v1035_v58, 0  ;;  %v3319_v5 = vld [vmem:[#allocation8 + $0x18] sm:$0xff]   ;;  %vm1083_vm7 = vcmask 64512   ;;  %v1096_v16 = vld [vmem:[#allocation3] sm:$0xf]  ;;  %vm1100_vm8 = vcmask 1043456  }
 0x400   : > { %2898 = vmatprep.subr.bf16.mxu0 %v3907_v56  ;;  %2906 = vmatprep.mubr.msk.bf16.mxu1 %vm3908_vm4, %v3907_v56  ;;  %v1102_v17 = vsel %vm1100_vm8, %v1096_v16, 0  ;;  %v1212_v24 = vld [vmem:[#allocation2 + $0x4] sm:$0xf]  ;;  %v2745_v26 = vld [vmem:[#allocation10 + $0x1] ss:$0 sm:$0xff]  ;;  %s3909_s30 = smov 4  }
 0x401   : > { %2905 = vmatpush3.bf16.xpose.msra.mxu1 %v1041_v59  ;;  %v1217_v28 = vsel %vm1036_vm5, %v1212_v24, 0  ;;  %v3320_v31 = vld [vmem:[#allocation8 + $0x20] sm:$0xff]   ;;  %v3321_v32 = vld [vmem:[#allocation8 + $0x28] sm:$0xff]   ;;  %v1392_v55 = vld [vmem:[#allocation2 + $0x8] sm:$0xf]  ;;  %vm1323_vm9 = vcmask 64544  }
 0x402   : > { %2916 = vmatprep.subr.bf16.mxu1 %v3907_v56  ;;  %v1272_v47 = vld [vmem:[#allocation3 + $0x4] sm:$0xf]  ;;  %v2751_v58 = vld [vmem:[#allocation10 + $0x2] ss:$0 sm:$0xff]  ;;  %v1452_v16 = vld [vmem:[#allocation3 + $0x8] sm:$0xf] }
 0x403   : > { %s2737_s6 = sshll.u32 %s4799_s28, 3  ;;  %2899 = vmatpush3.bf16.msra.mxu0 %v3317_v57  ;;  %v1277_v48 = vsel %vm1100_vm8, %v1272_v47, 0  ;;  %v1572_v24 = vld [vmem:[#allocation2 + $0xc] sm:$0xf]  ;;  %s3911_s4 = smov 8   ;;  %vm1503_vm10 = vcmask 97344  }
 0x404   : > { %s962_s14 = sshra.s32 %s2737_s6, 3  ;;  %2910 = vmatprep.subr.bf16.mxu0 %v3907_v56  ;;  %v1632_v47 = vld [vmem:[#allocation3 + $0xc] sm:$0xf]  ;;  %s3912_s20 = smov 12   ;;  %vm1683_vm11 = vcmask 130144   ;;  %vm1863_vm12 = vcmask 162944  }
 0x405   : > { %s2738_s13 = sshll.u32 %s962_s14, 2  ;;  %s3913_s21 = smov 16   ;;  %vm2043_vm13 = vcmask 195744   ;;  %vm2223_vm14 = vcmask 228544   ;;  %vm2403_vm15 = vcmask 261344  }
 0x406   : > { %s965_s0 = scalar_lea.vmem %s542_s3, %s2738_s13 [#allocation5]  ;;  %s3910_s3 = smov 20  }
 0x407   : > { %v4485_v60 = vld [vmem:[%s965_s0] sm:$0xf]  ;;  %s3914_s26 = smov 24   ;;  %s4800_s1 = sld [smem:[#allocation42_spill]] }
 0x408   : > { %2901 = vmatmul.mubr.msk.bf16.vlgmr.msra.gmra.mrb[0].mxu0 %vm990_vm6, %v4485_v60  ;;  %s3915_s6 = smov 28   ;;  %p4803_p11 = scmp.ne.s32.totalorder %s4785_s29, 0 }
 0x409   : > { %2912 = vmatprep.mubr.msk.bf16.mxu0 %vm3908_vm4, %v3907_v56  ;;  %2911 = vmatpush3.bf16.msra.mxu0 %v1102_v17  ;;  %v1457_v17 = vsel %vm1100_vm8, %v1452_v16, 0 }
 0x40a   : > { %2924 = vmatprep.subr.bf16.mxu0 %v3907_v56 }
 0x40d   : > { %s2792_s13 = sshll.u32 %s4800_s1, 1 }
 0x40e   : > { %s2486_s0 = sadd.s32 %s4799_s28, %s2792_s13  ;;  %s2475_s28 = scalar_lea.sflag [#allocation7], %s630_s25 }
 0x4db   : > { %v1028_v62 = vpop.f32.mrb[0].mxu0 }
 0x4dc   : > { %v1029_v63 = vadd.f32 %v2739_v61, %v1028_v62  ;;  %v2902_v0 = vpop.f32.mrb[1].mxu0  ;;  %v1397_v61 = vsel %vm1036_vm5, %v1392_v55, 0  ;;  %v1752_v55 = vld [vmem:[#allocation2 + $0x10] sm:$0xf] }
 0x4dd   : > { %v1031_v1 = vpop.f32.mrb[2].mxu0  ;;  %v3322_v0 = vld [vmem:[#allocation8 + $0x30] sm:$0xff]  }
 0x4de   : > { %v1034_v2 = vpack.c.bf16 %v1029_v63, %v1029_v63  ;;  %v2903_v3 = vpop.f32.mrb[3].mxu0  ;;  %v3323_v1 = vld [vmem:[#allocation8 + $0x38] sm:$0xff]  }
 0x4e0   : > { %2907 = vmatmul.mubr.msk.bf16.vlgmr.msra.gmra.mrb[0].mxu1 %vm1036_vm5, %v1034_v2 }
 0x4e1   : > { %2920 = vmatprep.mubr.msk.bf16.mxu1 %vm3908_vm4, %v3907_v56  ;;  %2917 = vmatpush3.bf16.msra.mxu1 %v3318_v4 }
 0x4e2   : > { %2918 = vmatprep.subr.bf16.mxu1 %v3907_v56 }
 0x4e5   : > { %2919 = vmatpush3.bf16.msra.mxu1 %v3319_v5 }
 0x4e6   : > { %2930 = vmatprep.subr.bf16.mxu1 %v3907_v56 }
 0x4e8   : > { %2921 = vmatmul.mubr.msk.bf16.vlgmr.msra.gmra.mrb[4].mxu1 %vm990_vm6, %v4485_v60 }
 0x4e9   : > { %2932 = vmatprep.mubr.msk.bf16.mxu1 %vm3908_vm4, %v3907_v56  ;;  %2931 = vmatpush3.bf16.msra.mxu1 %v1277_v48  ;;  %v1637_v48 = vsel %vm1100_vm8, %v1632_v47, 0 }
 0x4ea   : > { %2944 = vmatprep.subr.bf16.mxu1 %v3907_v56 }
 0x5b3   : > { %v1077_v6 = vpop.f32.mrb[0].mxu1 }
 0x5b4   : > { %v2908_v7 = vpop.f32.mrb[1].mxu1  ;;  %v1084_v8 = vsel %vm1083_vm7, %v1077_v6, -inf }
 0x5b5   : > { %1085 = vmax.xlane.f32.xlu0 %v1084_v8  ;;  %v1080_v9 = vpop.f32.mrb[2].mxu1 }
 0x5b6   : > { %v2909_v10 = vpop.f32.mrb[3].mxu1 }
 0x5bb   : > { %v1204_v18 = vpop.f32.mrb[4].mxu1 }
 0x5bc   : > { %v2922_v19 = vpop.f32.mrb[5].mxu1  ;;  %v1205_v29 = vadd.f32 %v2745_v26, %v1204_v18  ;;  %v2757_v26 = vld [vmem:[#allocation10 + $0x3] ss:$0 sm:$0xff] }
 0x5bd   : > { %v1207_v20 = vpop.f32.mrb[6].mxu1 }
 0x5be   : > { %v2923_v21 = vpop.f32.mrb[7].mxu1  ;;  %v1210_v30 = vpack.c.bf16 %v1205_v29, %v1205_v29 }
 0x642   : > { %v1086_v11 = vpop.xlane.xlu0 %1085 }
 0x643   : > { %v1087_v12 = vsub.f32 %v1077_v6, %v1086_v11 }
 0x645   : > { %v1088_v13 = vmul.f32 1.442695, %v1087_v12 }
 0x647   : > { %3334 = vpow2.f32 %v1088_v13 }
 0x651   : > { %v3335_v14 = vpop.eup %3334 }
 0x652   : > { %v1090_v15 = vsel %vm1083_vm7, %v3335_v14, 0.0 }
 0x653   : > { %1091 = vadd.xlane.f32.xlu0 %v1090_v15 }
 0x6e0   : > { %v1092_v22 = vpop.xlane.xlu0 %1091 }
 0x6e1   : > { %3336 = vrcp.f32 %v1092_v22 }
 0x6eb   : > { %v3337_v23 = vpop.eup %3336 }
 0x6ec   : > { %v1094_v25 = vmul.f32 %v3337_v23, %v3335_v14 }
 0x6ee   : > { %v1095_v27 = vpack.c.bf16 %v1094_v25, %v1094_v25 }
 0x6f0   : > { %2913 = vmatmul.mubr.msk.bf16.vlgmr.msra.gmra.mrb[4].mxu0 %vm1083_vm7, %v1095_v27 }
 0x6f1   : > { %2925 = vmatpush3.bf16.xpose.msra.mxu0 %v1217_v28  ;;  %2926 = vmatprep.mubr.msk.bf16.mxu0 %vm3908_vm4, %v3907_v56  ;;  %v1577_v28 = vsel %vm1036_vm5, %v1572_v24, 0 }
 0x6f2   : > { %2936 = vmatprep.subr.bf16.mxu0 %v3907_v56 }
 0x6f8   : > { %2927 = vmatmul.mubr.msk.bf16.vlgmr.msra.gmra.mrb[8].mxu0 %vm1036_vm5, %v1210_v30 }
 0x6f9   : > { %2940 = vmatprep.mubr.msk.bf16.mxu0 %vm3908_vm4, %v3907_v56  ;;  %2937 = vmatpush3.bf16.msra.mxu0 %v3320_v31  ;;  %v3324_v31 = vld [vmem:[#allocation8 + $0x40] sm:$0xff]  }
 0x6fa   : > { %2938 = vmatprep.subr.bf16.mxu0 %v3907_v56 }
 0x6fd   : > { %2939 = vmatpush3.bf16.msra.mxu0 %v3321_v32  ;;  %v3325_v32 = vld [vmem:[#allocation8 + $0x48] sm:$0xff]  }
 0x6fe   : > { %2950 = vmatprep.subr.bf16.mxu0 %v3907_v56 }
 0x700   : > { %2941 = vmatmul.mubr.msk.bf16.vlgmr.msra.gmra.mrb[12].mxu0 %vm990_vm6, %v4485_v60 }
 0x701   : > { %2952 = vmatprep.mubr.msk.bf16.mxu0 %vm3908_vm4, %v3907_v56  ;;  %2951 = vmatpush3.bf16.msra.mxu0 %v1457_v17  ;;  %v1812_v17 = vld [vmem:[#allocation3 + $0x10] sm:$0xf] }
 0x702   : > { %2964 = vmatprep.subr.bf16.mxu0 %v3907_v56 }
 0x7c3   : > { %v1138_v33 = vpop.f32.mrb[4].mxu0 }
 0x7c4   : > { %1144 = vst.msk [vmem:[#allocation4] sm:$0xff] %vm1036_vm5, %v1138_v33  ;;  %v2914_v34 = vpop.f32.mrb[5].mxu0 }
 0x7c5   : > { %v1141_v35 = vpop.f32.mrb[6].mxu0 }
 0x7c6   : > { %v2915_v36 = vpop.f32.mrb[7].mxu0 }
 0x7cb   : > { %v1253_v37 = vpop.f32.mrb[8].mxu0 }
 0x7cc   : > { %v2928_v38 = vpop.f32.mrb[9].mxu0  ;;  %v1259_v39 = vsel %vm1083_vm7, %v1253_v37, -inf }
 0x7cd   : > { %1260 = vmax.xlane.f32.xlu1 %v1259_v39  ;;  %v1256_v40 = vpop.f32.mrb[10].mxu0 }
 0x7ce   : > { %v2929_v41 = vpop.f32.mrb[11].mxu0 }
 0x7d3   : > { %v1384_v49 = vpop.f32.mrb[12].mxu0 }
 0x7d4   : > { %v2942_v50 = vpop.f32.mrb[13].mxu0  ;;  %v1385_v62 = vadd.f32 %v2751_v58, %v1384_v49  ;;  %v2763_v58 = vld [vmem:[#allocation10 + $0x4] ss:$0 sm:$0xff] }
 0x7d5   : > { %v1387_v51 = vpop.f32.mrb[14].mxu0 }
 0x7d6   : > { %v2943_v52 = vpop.f32.mrb[15].mxu0  ;;  %v1390_v63 = vpack.c.bf16 %v1385_v62, %v1385_v62 }
 0x85a   : > { %v1261_v42 = vpop.xlane.xlu1 %1260 }
 0x85b   : > { %v1262_v43 = vsub.f32 %v1253_v37, %v1261_v42 }
 0x85d   : > { %v1263_v44 = vmul.f32 1.442695, %v1262_v43 }
 0x85f   : > { %3338 = vpow2.f32 %v1263_v44 }
 0x869   : > { %v3339_v45 = vpop.eup %3338 }
 0x86a   : > { %v1265_v46 = vsel %vm1083_vm7, %v3339_v45, 0.0 }
 0x86b   : > { %1266 = vadd.xlane.f32.xlu1 %v1265_v46 }
 0x8f8   : > { %v1267_v53 = vpop.xlane.xlu1 %1266 }
 0x8f9   : > { %3340 = vrcp.f32 %v1267_v53 }
 0x903   : > { %v3341_v54 = vpop.eup %3340 }
 0x904   : > { %v1269_v57 = vmul.f32 %v3341_v54, %v3339_v45 }
 0x906   : > { %v1270_v59 = vpack.c.bf16 %v1269_v57, %v1269_v57 }
 0x908   : > { %2933 = vmatmul.mubr.msk.bf16.vlgmr.msra.gmra.mrb[8].mxu1 %vm1083_vm7, %v1270_v59 }
 0x909   : > { %2945 = vmatpush3.bf16.xpose.msra.mxu1 %v1397_v61  ;;  %2946 = vmatprep.mubr.msk.bf16.mxu1 %vm3908_vm4, %v3907_v56  ;;  %v1757_v61 = vsel %vm1036_vm5, %v1752_v55, 0 }
 0x90a   : > { %2956 = vmatprep.subr.bf16.mxu1 %v3907_v56 }
 0x910   : > { %2947 = vmatmul.mubr.msk.bf16.vlgmr.msra.gmra.mrb[12].mxu1 %vm1036_vm5, %v1390_v63 }
 0x911   : > { %2960 = vmatprep.mubr.msk.bf16.mxu1 %vm3908_vm4, %v3907_v56  ;;  %2957 = vmatpush3.bf16.msra.mxu1 %v3322_v0  ;;  %v3326_v0 = vld [vmem:[#allocation8 + $0x50] sm:$0xff]  }
 0x912   : > { %2958 = vmatprep.subr.bf16.mxu1 %v3907_v56 }
 0x915   : > { %2959 = vmatpush3.bf16.msra.mxu1 %v3323_v1  ;;  %v3327_v1 = vld [vmem:[#allocation8 + $0x58] sm:$0xff]  }
 0x916   : > { %2970 = vmatprep.subr.bf16.mxu1 %v3907_v56 }
 0x918   : > { %2961 = vmatmul.mubr.msk.bf16.vlgmr.msra.gmra.mrb[16].mxu1 %vm990_vm6, %v4485_v60 }
 0x919   : > { %2972 = vmatprep.mubr.msk.bf16.mxu1 %vm3908_vm4, %v3907_v56  ;;  %2971 = vmatpush3.bf16.msra.mxu1 %v1637_v48 }
 0x91a   : > { %2984 = vmatprep.subr.bf16.mxu1 %v3907_v56 }
 0x9db   : > { %v4538_v2 = vpop.f32.mrb[8].mxu1 }
 0x9dc   : > { %v2934_v3 = vpop.f32.mrb[9].mxu1 }
 0x9dd   : > { %v1316_v4 = vpop.f32.mrb[10].mxu1 }
 0x9de   : > { %v2935_v5 = vpop.f32.mrb[11].mxu1 }
 0x9e3   : > { %v1433_v6 = vpop.f32.mrb[12].mxu1 }
 0x9e4   : > { %v2948_v7 = vpop.f32.mrb[13].mxu1  ;;  %v1439_v8 = vsel %vm1083_vm7, %v1433_v6, -inf }
 0x9e5   : > { %1440 = vmax.xlane.f32.xlu0 %v1439_v8  ;;  %v1436_v9 = vpop.f32.mrb[14].mxu1 }
 0x9e6   : > { %v2949_v10 = vpop.f32.mrb[15].mxu1 }
 0x9eb   : > { %v1564_v18 = vpop.f32.mrb[16].mxu1 }
 0x9ec   : > { %v2962_v19 = vpop.f32.mrb[17].mxu1  ;;  %v1565_v29 = vadd.f32 %v2757_v26, %v1564_v18  ;;  %v1817_v18 = vsel %vm1100_vm8, %v1812_v17, 0 }
 0x9ed   : > { %v1567_v20 = vpop.f32.mrb[18].mxu1 }
 0x9ee   : > { %v2963_v21 = vpop.f32.mrb[19].mxu1  ;;  %v1570_v30 = vpack.c.bf16 %v1565_v29, %v1565_v29 }
 0xa72   : > { %v1441_v11 = vpop.xlane.xlu0 %1440 }
 0xa73   : > { %v1442_v12 = vsub.f32 %v1433_v6, %v1441_v11 }
 0xa75   : > { %v1443_v13 = vmul.f32 1.442695, %v1442_v12 }
 0xa77   : > { %3342 = vpow2.f32 %v1443_v13 }
 0xa81   : > { %v3343_v14 = vpop.eup %3342 }
 0xa82   : > { %v1445_v15 = vsel %vm1083_vm7, %v3343_v14, 0.0 }
 0xa83   : > { %1446 = vadd.xlane.f32.xlu1 %v1445_v15 }
 0xb10   : > { %v1447_v22 = vpop.xlane.xlu1 %1446 }
 0xb11   : > { %3344 = vrcp.f32 %v1447_v22 }
 0xb1b   : > { %v3345_v23 = vpop.eup %3344 }
 0xb1c   : > { %v1449_v25 = vmul.f32 %v3345_v23, %v3343_v14 }
 0xb1e   : > { %v1450_v27 = vpack.c.bf16 %v1449_v25, %v1449_v25  ;;  %v1932_v25 = vld [vmem:[#allocation2 + $0x14] sm:$0xf] }
 0xb1f   : > { %v1937_v29 = vsel %vm1036_vm5, %v1932_v25, 0 }
 0xb20   : > { %2953 = vmatmul.mubr.msk.bf16.vlgmr.msra.gmra.mrb[16].mxu0 %vm1083_vm7, %v1450_v27  ;;  %v2769_v27 = vld [vmem:[#allocation10 + $0x5] ss:$0 sm:$0xff] }
 0xb21   : > { %2965 = vmatpush3.bf16.xpose.msra.mxu0 %v1577_v28  ;;  %2966 = vmatprep.mubr.msk.bf16.mxu0 %vm3908_vm4, %v3907_v56 }
 0xb22   : > { %2976 = vmatprep.subr.bf16.mxu0 %v3907_v56 }
 0xb28   : > { %2967 = vmatmul.mubr.msk.bf16.vlgmr.msra.gmra.mrb[20].mxu0 %vm1036_vm5, %v1570_v30 }
 0xb29   : > { %2980 = vmatprep.mubr.msk.bf16.mxu0 %vm3908_vm4, %v3907_v56  ;;  %2977 = vmatpush3.bf16.msra.mxu0 %v3324_v31 }
 0xb2a   : > { %2978 = vmatprep.subr.bf16.mxu0 %v3907_v56 }
 0xb2d   : > { %2979 = vmatpush3.bf16.msra.mxu0 %v3325_v32  ;;  %v3328_v32 = vld [vmem:[#allocation8 + $0x60] sm:$0xff]  }
 0xb2e   : > { %2990 = vmatprep.subr.bf16.mxu0 %v3907_v56 }
 0xb30   : > { %2981 = vmatmul.mubr.msk.bf16.vlgmr.msra.gmra.mrb[24].mxu0 %vm990_vm6, %v4485_v60 }
 0xb31   : > { %2992 = vmatprep.mubr.msk.bf16.mxu0 %vm3908_vm4, %v3907_v56  ;;  %2991 = vmatpush3.bf16.msra.mxu0 %v1817_v18 }
 0xb32   : > { %3004 = vmatprep.subr.bf16.mxu0 %v3907_v56 }
 0xbf3   : > { %v4558_v33 = vpop.f32.mrb[16].mxu0 }
 0xbf4   : > { %v2954_v34 = vpop.f32.mrb[17].mxu0 }
 0xbf5   : > { %v1496_v35 = vpop.f32.mrb[18].mxu0  ;;  %v3329_v34 = vld [vmem:[#allocation8 + $0x68] sm:$0xff]  }
 0xbf6   : > { %v2955_v36 = vpop.f32.mrb[19].mxu0 }
 0xbfb   : > { %v1613_v37 = vpop.f32.mrb[20].mxu0 }
 0xbfc   : > { %v2968_v38 = vpop.f32.mrb[21].mxu0  ;;  %v1619_v39 = vsel %vm1083_vm7, %v1613_v37, -inf }
 0xbfd   : > { %1620 = vmax.xlane.f32.xlu0 %v1619_v39  ;;  %v1616_v40 = vpop.f32.mrb[22].mxu0 }
 0xbfe   : > { %v2969_v41 = vpop.f32.mrb[23].mxu0 }
 0xc03   : > { %v1744_v49 = vpop.f32.mrb[24].mxu0 }
 0xc04   : > { %v2982_v50 = vpop.f32.mrb[25].mxu0  ;;  %v1745_v62 = vadd.f32 %v2763_v58, %v1744_v49  ;;  %v1992_v49 = vld [vmem:[#allocation3 + $0x14] sm:$0xf]  ;;  %v2112_v58 = vld [vmem:[#allocation2 + $0x18] sm:$0xf] }
 0xc05   : > { %v1747_v51 = vpop.f32.mrb[26].mxu0  ;;  %v1997_v50 = vsel %vm1100_vm8, %v1992_v49, 0 }
 0xc06   : > { %v2983_v52 = vpop.f32.mrb[27].mxu0  ;;  %v1750_v63 = vpack.c.bf16 %v1745_v62, %v1745_v62 }
 0xc8a   : > { %v1621_v42 = vpop.xlane.xlu0 %1620 }
 0xc8b   : > { %v1622_v43 = vsub.f32 %v1613_v37, %v1621_v42 }
 0xc8d   : > { %v1623_v44 = vmul.f32 1.442695, %v1622_v43 }
 0xc8f   : > { %3346 = vpow2.f32 %v1623_v44 }
 0xc99   : > { %v3347_v45 = vpop.eup %3346 }
 0xc9a   : > { %v1625_v46 = vsel %vm1083_vm7, %v3347_v45, 0.0 }
 0xc9b   : > { %1626 = vadd.xlane.f32.xlu1 %v1625_v46 }
 0xd28   : > { %v1627_v53 = vpop.xlane.xlu1 %1626 }
 0xd29   : > { %3348 = vrcp.f32 %v1627_v53 }
 0xd33   : > { %v3349_v54 = vpop.eup %3348 }
 0xd34   : > { %v1629_v57 = vmul.f32 %v3349_v54, %v3347_v45 }
 0xd36   : > { %v1630_v59 = vpack.c.bf16 %v1629_v57, %v1629_v57 }
 0xd38   : > { %2973 = vmatmul.mubr.msk.bf16.vlgmr.msra.gmra.mrb[20].mxu1 %vm1083_vm7, %v1630_v59 }
 0xd39   : > { %2985 = vmatpush3.bf16.xpose.msra.mxu1 %v1757_v61  ;;  %2986 = vmatprep.mubr.msk.bf16.mxu1 %vm3908_vm4, %v3907_v56  ;;  %v2775_v61 = vld [vmem:[#allocation10 + $0x6] ss:$0 sm:$0xff] }
 0xd3a   : > { %2996 = vmatprep.subr.bf16.mxu1 %v3907_v56 }
 0xd40   : > { %2987 = vmatmul.mubr.msk.bf16.vlgmr.msra.gmra.mrb[24].mxu1 %vm1036_vm5, %v1750_v63  ;;  %v2117_v63 = vsel %vm1036_vm5, %v2112_v58, 0 }
 0xd41   : > { %3000 = vmatprep.mubr.msk.bf16.mxu1 %vm3908_vm4, %v3907_v56  ;;  %2997 = vmatpush3.bf16.msra.mxu1 %v3326_v0 }
 0xd42   : > { %2998 = vmatprep.subr.bf16.mxu1 %v3907_v56 }
 0xd45   : > { %2999 = vmatpush3.bf16.msra.mxu1 %v3327_v1 }
 0xd46   : > { %3010 = vmatprep.subr.bf16.mxu1 %v3907_v56 }
 0xd48   : > { %3001 = vmatmul.mubr.msk.bf16.vlgmr.msra.gmra.mrb[28].mxu1 %vm990_vm6, %v4485_v60 }
 0xd49   : > { %3012 = vmatprep.mubr.msk.bf16.mxu1 %vm3908_vm4, %v3907_v56  ;;  %3011 = vmatpush3.bf16.msra.mxu1 %v1997_v50 }
 0xd4a   : > { %3024 = vmatprep.subr.bf16.mxu1 %v3907_v56 }
 0xe0b   : > { %v4578_v3 = vpop.f32.mrb[20].mxu1 }
 0xe0c   : > { %v2974_v4 = vpop.f32.mrb[21].mxu1 }
 0xe0d   : > { %v1676_v5 = vpop.f32.mrb[22].mxu1  ;;  %v3330_v4 = vld [vmem:[#allocation8 + $0x70] sm:$0xff]  }
 0xe0e   : > { %v2975_v6 = vpop.f32.mrb[23].mxu1  ;;  %v3331_v5 = vld [vmem:[#allocation8 + $0x78] sm:$0xff]  }
 0xe13   : > { %v1793_v7 = vpop.f32.mrb[24].mxu1 }
 0xe14   : > { %v2988_v8 = vpop.f32.mrb[25].mxu1  ;;  %v1799_v9 = vsel %vm1083_vm7, %v1793_v7, -inf }
 0xe15   : > { %1800 = vmax.xlane.f32.xlu0 %v1799_v9  ;;  %v1796_v10 = vpop.f32.mrb[26].mxu1 }
 0xe16   : > { %v2989_v11 = vpop.f32.mrb[27].mxu1 }
 0xe1b   : > { %v1924_v19 = vpop.f32.mrb[28].mxu1 }
 0xe1c   : > { %v3002_v20 = vpop.f32.mrb[29].mxu1  ;;  %v1925_v30 = vadd.f32 %v2769_v27, %v1924_v19  ;;  %v2172_v19 = vld [vmem:[#allocation3 + $0x18] sm:$0xf]  ;;  %v2292_v27 = vld [vmem:[#allocation2 + $0x1c] sm:$0xf] }
 0xe1d   : > { %v1927_v21 = vpop.f32.mrb[30].mxu1  ;;  %v2177_v20 = vsel %vm1100_vm8, %v2172_v19, 0 }
 0xe1e   : > { %v3003_v22 = vpop.f32.mrb[31].mxu1  ;;  %v1930_v31 = vpack.c.bf16 %v1925_v30, %v1925_v30 }
 0xea2   : > { %v1801_v12 = vpop.xlane.xlu0 %1800 }
 0xea3   : > { %v1802_v13 = vsub.f32 %v1793_v7, %v1801_v12 }
 0xea5   : > { %v1803_v14 = vmul.f32 1.442695, %v1802_v13 }
 0xea7   : > { %3350 = vpow2.f32 %v1803_v14 }
 0xeb1   : > { %v3351_v15 = vpop.eup %3350 }
 0xeb2   : > { %v1805_v16 = vsel %vm1083_vm7, %v3351_v15, 0.0 }
 0xeb3   : > { %1806 = vadd.xlane.f32.xlu1 %v1805_v16 }
 0xf40   : > { %v1807_v23 = vpop.xlane.xlu1 %1806 }
 0xf41   : > { %3352 = vrcp.f32 %v1807_v23 }
 0xf4b   : > { %v3353_v24 = vpop.eup %3352 }
 0xf4c   : > { %v1809_v26 = vmul.f32 %v3353_v24, %v3351_v15 }
 0xf4e   : > { %v1810_v28 = vpack.c.bf16 %v1809_v26, %v1809_v26 }
 0xf50   : > { %2993 = vmatmul.mubr.msk.bf16.vlgmr.msra.gmra.mrb[28].mxu0 %vm1083_vm7, %v1810_v28 }
 0xf51   : > { %3005 = vmatpush3.bf16.xpose.msra.mxu0 %v1937_v29  ;;  %3006 = vmatprep.mubr.msk.bf16.mxu0 %vm3908_vm4, %v3907_v56  ;;  %v2781_v29 = vld [vmem:[#allocation10 + $0x7] ss:$0 sm:$0xff] }
 0xf52   : > { %3016 = vmatprep.subr.bf16.mxu0 %v3907_v56 }
 0xf58   : > { %3007 = vmatmul.mubr.msk.bf16.vlgmr.msra.gmra.mrb[32].mxu0 %vm1036_vm5, %v1930_v31  ;;  %v2297_v31 = vsel %vm1036_vm5, %v2292_v27, 0 }
 0xf59   : > { %3020 = vmatprep.mubr.msk.bf16.mxu0 %vm3908_vm4, %v3907_v56  ;;  %3017 = vmatpush3.bf16.msra.mxu0 %v3328_v32 }
 0xf5a   : > { %3018 = vmatprep.subr.bf16.mxu0 %v3907_v56 }
 0xf5d   : > { %3019 = vmatpush3.bf16.msra.mxu0 %v3329_v34 }
 0xf5e   : > { %3030 = vmatprep.subr.bf16.mxu0 %v3907_v56 }
 0xf60   : > { %3021 = vmatmul.mubr.msk.bf16.vlgmr.msra.gmra.mrb[36].mxu0 %vm990_vm6, %v4485_v60 }
 0xf61   : > { %3032 = vmatprep.mubr.msk.bf16.mxu0 %vm3908_vm4, %v3907_v56  ;;  %3031 = vmatpush3.bf16.msra.mxu0 %v2177_v20 }
 0xf62   : > { %3044 = vmatprep.subr.bf16.mxu0 %v3907_v56 }
0x1023   : > { %v4598_v35 = vpop.f32.mrb[28].mxu0 }
0x1024   : > { %v2994_v36 = vpop.f32.mrb[29].mxu0 }
0x1025   : > { %v1856_v37 = vpop.f32.mrb[30].mxu0 }
0x1026   : > { %v2995_v38 = vpop.f32.mrb[31].mxu0 }
0x102b   : > { %v1973_v39 = vpop.f32.mrb[32].mxu0 }
0x102c   : > { %v3008_v40 = vpop.f32.mrb[33].mxu0  ;;  %v1979_v41 = vsel %vm1083_vm7, %v1973_v39, -inf }
0x102d   : > { %1980 = vmax.xlane.f32.xlu0 %v1979_v41  ;;  %v1976_v42 = vpop.f32.mrb[34].mxu0 }
0x102e   : > { %v3009_v43 = vpop.f32.mrb[35].mxu0 }
0x1033   : > { %v2104_v51 = vpop.f32.mrb[36].mxu0 }
0x1034   : > { %v3022_v52 = vpop.f32.mrb[37].mxu0  ;;  %v2105_v0 = vadd.f32 %v2775_v61, %v2104_v51  ;;  %v3333_v61 = vld [vmem:[#allocation23 + $0x8] sm:$0xff]  }
0x1035   : > { %v2107_v53 = vpop.f32.mrb[38].mxu0 }
0x1036   : > { %v3023_v54 = vpop.f32.mrb[39].mxu0  ;;  %v2110_v1 = vpack.c.bf16 %v2105_v0, %v2105_v0 }
0x10ba   : > { %v1981_v44 = vpop.xlane.xlu0 %1980 }
0x10bb   : > { %v1982_v45 = vsub.f32 %v1973_v39, %v1981_v44 }
0x10bd   : > { %v1983_v46 = vmul.f32 1.442695, %v1982_v45 }
0x10bf   : > { %3354 = vpow2.f32 %v1983_v46 }
0x10c9   : > { %v3355_v47 = vpop.eup %3354 }
0x10ca   : > { %v1985_v48 = vsel %vm1083_vm7, %v3355_v47, 0.0 }
0x10cb   : > { %1986 = vadd.xlane.f32.xlu1 %v1985_v48 }
0x1158   : > { %v1987_v55 = vpop.xlane.xlu1 %1986 }
0x1159   : > { %3356 = vrcp.f32 %v1987_v55 }
0x1163   : > { %v3357_v57 = vpop.eup %3356 }
0x1164   : > { %v1989_v59 = vmul.f32 %v3357_v57, %v3355_v47 }
0x1166   : > { %v1990_v62 = vpack.c.bf16 %v1989_v59, %v1989_v59  ;;  %v3332_v59 = vld [vmem:[#allocation23] sm:$0xff]  }
0x1168   : > { %3013 = vmatmul.mubr.msk.bf16.vlgmr.msra.gmra.mrb[32].mxu1 %vm1083_vm7, %v1990_v62 }
0x1169   : > { %3025 = vmatpush3.bf16.xpose.msra.mxu1 %v2117_v63  ;;  %3026 = vmatprep.mubr.msk.bf16.mxu1 %vm3908_vm4, %v3907_v56 }
0x116a   : > { %3036 = vmatprep.subr.bf16.mxu1 %v3907_v56 }
0x1170   : > { %3027 = vmatmul.mubr.msk.bf16.vlgmr.msra.gmra.mrb[36].mxu1 %vm1036_vm5, %v2110_v1 }
0x1171   : > { %3040 = vmatprep.mubr.msk.bf16.mxu1 %vm3908_vm4, %v3907_v56  ;;  %3037 = vmatpush3.bf16.msra.mxu1 %v3330_v4 }
0x1172   : > { %3038 = vmatprep.subr.bf16.mxu1 %v3907_v56 }
0x1175   : > { %3039 = vmatpush3.bf16.msra.mxu1 %v3331_v5 }
0x1176   : > { %3050 = vmatprep.subr.bf16.mxu1 %v3907_v56 }
0x1178   : > { %3041 = vmatmul.mubr.msk.bf16.vlgmr.msra.gmra.mrb[40].mxu1 %vm990_vm6, %v4485_v60 }
0x1179   : > { %3052 = vmatprep.mubr.msk.bf16.mxu1 %vm3908_vm4, %v3907_v56 }
0x123b   : > { %v2033_v6 = vpop.f32.mrb[32].mxu1 }
0x123c   : > { %v3014_v7 = vpop.f32.mrb[33].mxu1 }
0x123d   : > { %v2036_v8 = vpop.f32.mrb[34].mxu1 }
0x123e   : > { %v3015_v9 = vpop.f32.mrb[35].mxu1 }
0x1243   : > { %v2153_v10 = vpop.f32.mrb[36].mxu1 }
0x1244   : > { %v3028_v11 = vpop.f32.mrb[37].mxu1  ;;  %v2159_v12 = vsel %vm1083_vm7, %v2153_v10, -inf }
0x1245   : > { %2160 = vmax.xlane.f32.xlu0 %v2159_v12  ;;  %v2156_v13 = vpop.f32.mrb[38].mxu1 }
0x1246   : > { %v3029_v14 = vpop.f32.mrb[39].mxu1 }
0x124b   : > { %v2284_v21 = vpop.f32.mrb[40].mxu1 }
0x124c   : > { %v3042_v22 = vpop.f32.mrb[41].mxu1  ;;  %v2285_v32 = vadd.f32 %v2781_v29, %v2284_v21 }
0x124d   : > { %v2287_v23 = vpop.f32.mrb[42].mxu1 }
0x124e   : > { %v3043_v24 = vpop.f32.mrb[43].mxu1  ;;  %v2290_v34 = vpack.c.bf16 %v2285_v32, %v2285_v32 }
0x12d2   : > { %v2161_v15 = vpop.xlane.xlu0 %2160 }
0x12d3   : > { %v2162_v16 = vsub.f32 %v2153_v10, %v2161_v15 }
0x12d5   : > { %v2163_v17 = vmul.f32 1.442695, %v2162_v16 }
0x12d7   : > { %3358 = vpow2.f32 %v2163_v17 }
0x12e1   : > { %v3359_v18 = vpop.eup %3358 }
0x12e2   : > { %v2165_v60 = vsel %vm1083_vm7, %v3359_v18, 0.0 }
0x12e3   : > { %2166 = vadd.xlane.f32.xlu1 %v2165_v60 }
0x1370   : > { %v2167_v25 = vpop.xlane.xlu1 %2166 }
0x1371   : > { %3360 = vrcp.f32 %v2167_v25 }
0x137b   : > { %v3361_v26 = vpop.eup %3360 }
0x137c   : > { %v2169_v28 = vmul.f32 %v3361_v26, %v3359_v18 }
0x137e   : > { %v2170_v30 = vpack.c.bf16 %v2169_v28, %v2169_v28 }
0x1380   : > { %3033 = vmatmul.mubr.msk.bf16.vlgmr.msra.gmra.mrb[40].mxu0 %vm1083_vm7, %v2170_v30 }
0x1381   : > { %3045 = vmatpush3.bf16.xpose.msra.mxu0 %v2297_v31  ;;  %3046 = vmatprep.mubr.msk.bf16.mxu0 %vm3908_vm4, %v3907_v56 }
0x1382   : > { %3056 = vmatprep.subr.bf16.mxu0 %v3907_v56 }
0x1388   : > { %3047 = vmatmul.mubr.msk.bf16.vlgmr.msra.gmra.mrb[44].mxu0 %vm1036_vm5, %v2290_v34 }
0x1389   : > { %3060 = vmatprep.mubr.msk.bf16.mxu0 %vm3908_vm4, %v3907_v56  ;;  %3057 = vmatpush3.bf16.msra.mxu0 %v3332_v59 }
0x138a   : > { %3058 = vmatprep.subr.bf16.mxu0 %v3907_v56  ;;  %v2787_v56 = vld [vmem:[#allocation25] ss:$0 sm:$0xff] }
0x138d   : > { %3059 = vmatpush3.bf16.msra.mxu0 %v3333_v61 }
0x1453   : > { %v2213_v36 = vpop.f32.mrb[40].mxu0 }
0x1454   : > { %v3034_v37 = vpop.f32.mrb[41].mxu0 }
0x1455   : > { %v2216_v38 = vpop.f32.mrb[42].mxu0 }
0x1456   : > { %v3035_v39 = vpop.f32.mrb[43].mxu0 }
0x145b   : > { %v2333_v40 = vpop.f32.mrb[44].mxu0 }
0x145c   : > { %v3048_v41 = vpop.f32.mrb[45].mxu0  ;;  %v2339_v42 = vsel %vm1083_vm7, %v2333_v40, -inf }
0x145d   : > { %2340 = vmax.xlane.f32.xlu0 %v2339_v42  ;;  %v2336_v43 = vpop.f32.mrb[46].mxu0 }
0x145e   : > { %v3049_v44 = vpop.f32.mrb[47].mxu0 }
0x1473   : > { %1320 = vrot.lane.b32.xlu0 %v4538_v2, %s3909_s30  ;;  %v2352_v2 = vld [vmem:[#allocation3 + $0x1c] sm:$0xf]  ;;  %s2793_s30 = sshll.u32 %s2486_s0, 7 }
0x1474   : > { %v2357_v51 = vsel %vm1100_vm8, %v2352_v2, 0 }
0x1475   : > { %3051 = vmatpush3.bf16.msra.mxu1 %v2357_v51 }
0x1477   : > { %2040 = vrot.lane.b32.xlu0 %v2033_v6, %s3910_s3  ;;  %s2490_s3 = sshll.u32 %s632_s15, 4  ;;  %s4649_s3 = int_to_ptr.vmem [resolvable:$true] %s2490_s3 }
0x1478   : > { %s3732_s1 = scalar_lea.vmem %s4649_s3, 128 }
0x1479   : > { %p3733_p3 = scmp.ne.s32.totalorder %s4649_s3, %s3732_s1 }
0x147b   : > { %p3734_p4 = pnand %p3733_p3, %p4803_p11 }
0x147d   : > { %p3735_p10 = pneg %p3734_p4 }
0x14ea   : > { %v2341_v45 = vpop.xlane.xlu0 %2340 }
0x14eb   : > { %v2342_v46 = vsub.f32 %v2333_v40, %v2341_v45 }
0x14ed   : > { %v2343_v47 = vmul.f32 1.442695, %v2342_v46 }
0x14ee   : > { %v1321_v48 = vpop.permute.xlu0 %1320 }
0x14ef   : > { %3362 = vpow2.f32 %v2343_v47  ;;  %1324 = vst.msk [vmem:[#allocation4] sm:$0xff] %vm1323_vm9, %v1321_v48 }
0x14f2   : > { %v2041_v57 = vpop.permute.xlu0 %2040 }
0x14f9   : > { %v3363_v49 = vpop.eup %3362 }
0x14fa   : > { %v2345_v50 = vsel %vm1083_vm7, %v3363_v49, 0.0 }
0x14fb   : > { %2346 = vadd.xlane.f32.xlu1 %v2345_v50 }
0x150c   : > { %1500 = vrot.lane.b32.xlu1 %v4558_v33, %s3911_s4 }
0x1510   : > { %1680 = vrot.lane.b32.xlu1 %v4578_v3, %s3912_s20 }
0x1514   : > { %1860 = vrot.lane.b32.xlu1 %v4598_v35, %s3913_s21  ;;  %s4802_s21 = sld [smem:[#allocation52_spill]] }
0x1518   : > { %2220 = vrot.lane.b32.xlu1 %v2213_v36, %s3914_s26 }
0x151a   : > { %s4647_s26 = scalar_lea.hbm %s4802_s21, %s2793_s30 }
0x1588   : > { %v2347_v52 = vpop.xlane.xlu1 %2346 }
0x1589   : > { %3364 = vrcp.f32 %v2347_v52 }
0x158c   : > { %v1501_v53 = vpop.permute.xlu1 %1500 }
0x158d   : > { %1504 = vst.msk [vmem:[#allocation4] sm:$0xff] %vm1503_vm10, %v1501_v53 }
0x1590   : > { %v1681_v54 = vpop.permute.xlu1 %1680 }
0x1591   : > { %1684 = vst.msk [vmem:[#allocation4] sm:$0xff] %vm1683_vm11, %v1681_v54 }
0x1593   : > { %v3365_v33 = vpop.eup %3364 }
0x1594   : > { %v2349_v3 = vmul.f32 %v3365_v33, %v3363_v49  ;;  %v1861_v55 = vpop.permute.xlu1 %1860 }
0x1595   : > { %1864 = vst.msk [vmem:[#allocation4] sm:$0xff] %vm1863_vm12, %v1861_v55 }
0x1596   : > { %v2350_v35 = vpack.c.bf16 %v2349_v3, %v2349_v3  ;;  %2044 = vst.msk [vmem:[#allocation4] sm:$0xff] %vm2043_vm13, %v2041_v57 }
0x1598   : > { %3053 = vmatmul.mubr.msk.bf16.vlgmr.msra.gmra.mrb[44].mxu1 %vm1083_vm7, %v2350_v35  ;;  %v2221_v58 = vpop.permute.xlu1 %2220 }
0x1599   : > { %2224 = vst.msk [vmem:[#allocation4] sm:$0xff] %vm2223_vm14, %v2221_v58 }
0x166b   : > { %v2393_v62 = vpop.f32.mrb[44].mxu1 }
0x166c   : > { %2400 = vrot.lane.b32.xlu0 %v2393_v62, %s3915_s6  ;;  %v3054_v63 = vpop.f32.mrb[45].mxu1  ;;  %s3916_s6 = smov [#allocation26]  }
0x166d   : > { %v2396_v0 = vpop.f32.mrb[46].mxu1  ;;  %s3736_s13 = sshll.u32 %s3916_s6, 4  ;;  %s3737_s13 = int_to_ptr.vmem [resolvable:$false] %s3736_s13 }
0x166e   : > { %v3055_v1 = vpop.f32.mrb[47].mxu1  ;;  %s3738_s0 = scalar_lea.vmem %s3737_s13, 256  ;;  %p3739_p7 = scmp.lt.s32.totalorder %s4649_s3, %s3737_s13 }
0x166f   : > { %p3740_p1 = scmp.lt.s32.totalorder %s3738_s0, %s3732_s1 }
0x1671   : > { %p3741_p5 = por %p3740_p1, %p3739_p7 }
0x1673   : > { %p3742_p2 = pnand %p3741_p5, %p3735_p10 }
0x16de   : > { %v2401_v4 = vpop.permute.xlu0 %2400 }
0x16df   : > { %2404 = vst.msk [vmem:[#allocation4] sm:$0xff] %vm2403_vm15, %v2401_v4 }
0x16e6   : > { %v2405_v5 = vld [vmem:[#allocation4] sm:$0xff] }
0x16e7   : > { %v2406_v6 = vpack.c.bf16 %v2405_v5, %v2405_v5 }
0x16e9   : > { %3061 = vmatmul.mubr.msk.bf16.vlgmr.msra.gmra.mrb[48].mxu0 %vm990_vm6, %v2406_v6 }
0x17bc   : > { %v2467_v7 = vpop.f32.mrb[48].mxu0 }
0x17bd   : > { %v2468_v8 = vadd.f32 %v2787_v56, %v2467_v7  ;;  %v3062_v9 = vpop.f32.mrb[49].mxu0 }
0x17be   : > { %v2470_v10 = vpop.f32.mrb[50].mxu0 }
0x17bf   : > { %2473 = vst.msk [vmem:[%s632_s15] sm:$0xff] %vm990_vm6, %v2468_v8  ;;  %v3063_v11 = vpop.f32.mrb[51].mxu0 }
0x17c0   : > { %3745 = shalt.err (!%p3742_p2)
}
0x17c1   : > { %s3746_s25 = scalar_lea.hbm %s4647_s26, 128  ;;  %s3750_s14 = scalar_lea.hbm %s4802_s21, 512 }
0x17c2   : > { %p3747_p12 = scmp.ne.s32.totalorder %s4647_s26, %s3746_s25  ;;  %p3751_p13 = scmp.lt.u32.totalorder %s4647_s26, %s4802_s21 }
0x17c3   : > { %p3752_p9 = scmp.lt.u32.totalorder %s3750_s14, %s3746_s25  ;;  %p3754_p3 = scmp.lt.u32.totalorder %s3746_s25, %s4647_s26 }
0x17c4   : > { %p3748_p6 = pnand %p3747_p12, %p4803_p11 }
0x17c5   : > { %p3753_p0 = por %p3752_p9, %p3751_p13 }
0x17c6   : > { %p3749_p8 = pneg %p3748_p6 }
0x17c7   : > { %p3755_p4 = por %p3754_p3, %p3753_p0 }
0x17c9   : > { %p3756_p10 = pnand %p3755_p4, %p3749_p8 }
0x17cb   : > { %3759 = shalt.err (!%p3756_p10)
}
0x17cc   : > { %3114 = dma.vmem_to_hbm [thread:$0]  (%p4803_p11), %s4649_s3, 128, %s4647_s26, %s2475_s28  }
0x17cd PF: > { %s4804_s20 = sld [smem:[#allocation35_spill]]  ;;  %p3186_p7 = scmp.ge.s32.totalorder %s3878_s18, 2 }
0x17ce   : > { %p4805_p1 = scmp.ne.s32.totalorder %s4786_s2, 0 }
0x17d0   : > { %p3158_p5 = pnand %p3186_p7, %p4805_p1 }
0x17d3   : > { %s2502_s1 = sand.u32 1, %s4804_s20  }
0x17d4   : > { %s2503_s6 = scalar_lea.sflag [#allocation7], %s2502_s1 }
0x17d5   : > { %3833 = dma.done.wait (!%p3158_p5), %s2503_s6, 128  }
0x17d6   : > { %3835 = vsyncadd (!%p3158_p5), %s2503_s6, 4294967168  ;;  %s35_s18 = sadd.s32 1, %s3878_s18   ;;  %s4806_s25 = sld [smem:[#allocation36_spill]] }
0x17d7   : > { %p32_p2 = scmp.ge.s32.totalorder %s35_s18, 6   ;;  %s4807_s26 = sld [smem:[#allocation37_spill]] }
0x17d8   : > { %s4808_s28 = sld [smem:[#allocation39_spill]]  ;;  %s4809_s29 = sld [smem:[#allocation40_spill]] }
0x17d9   : > { %s4810_s3 = smov %s4352_s27  ;;  %s4811_s27 = smov %s4824_s19 }
0x17da   : > { %s4812_s30 = smov %s4810_s3  ;;  %s4813_s14 = smov %s3870_s16 }
0x17db   : > { %s4814_s15 = smov %s3874_s17  ;;  %s4815_s16 = smov %s4818_s24 }
0x17dc   : > { %s4816_s17 = smov %s4822_s22  ;;  %34 = sbr.rel (!%p32_p2) target bundleno = 24 (0x18), region = 212 }
0x17e3   :  { %2508 = vsyncpa [#allocation6], 1 }
0x17e4   :  { %2510 = vsyncpa [#allocation6 + $0x1], 1 }
0x17e5   :  { %2511 = vsyncpa [#allocation9], 1 }
0x17e6   :  { %2512 = vsyncpa [#allocation12], 1 }
0x17e7   :  { %2513 = vsyncpa [#allocation15], 1 }
0x17e8   :  { %2514 = vsyncpa [#allocation18], 1 }
0x17e9   :  { %2515 = vsyncpa [#allocation21], 1 }
0x17ea   :  { %2516 = vsyncpa [#allocation24], 1 }
0x17eb   :  { %2517 = vsyncpa [#allocation7], 1 }
0x17ec   :  { %2519 = vsyncpa [#allocation7 + $0x1], 1 }

</bundles_post_ra>
